<compile_context>
chip_gen: v7x
topology: tpu7x:2x2x1
jax: 0.10.0
libtpu: 0.0.40
codegen_flags: <defaults>
</compile_context>

<pallas_src>
import functools

import jax
import jax.numpy as jnp
from jax.experimental import pallas as pl
from jax.experimental.pallas import tpu as pltpu

HIDDEN = 512
EMB = 256
NUM_LAYERS = 2
VMEM_LIMIT = 32 * 1024 * 1024  # scoped-VMEM limit safe on v5e/v6e/v7x


def _round_up(x, m):
    return (x + m - 1) // m * m


# ----------------------------------------------------------------------------
# Pallas kernel: tiled matmul + bias (hoisted input projections + decoder).
# bf16 operands, f32 MXU accumulation, configurable output dtype.
# ----------------------------------------------------------------------------
def _matmul_bias_kernel(x_ref, w_ref, b_ref, o_ref):
    acc = jnp.dot(x_ref[...], w_ref[...],
                  preferred_element_type=jnp.float32) + b_ref[...]
    o_ref[...] = acc.astype(o_ref.dtype)


def matmul_bias(x, w, b, out_dtype=jnp.float32):
    """x: (M, K), w: (K, N) bf16, b: (1, N) f32 -> (M, N) out_dtype.

    N must be a multiple of 128 (callers pad the vocab / gate dims)."""
    M, K = x.shape
    N = w.shape[1]
    out_isz = jnp.dtype(out_dtype).itemsize

    # Row tile: multiple of 16 (full bf16 sublane packing), capped at 256.
    tm = min(_round_up(M, 16), 256)
    Mp = _round_up(M, tm)
    if Mp != M:
        x = jnp.pad(x, ((0, Mp - M), (0, 0)))

    x = x.astype(jnp.bfloat16)
    w = w.astype(jnp.bfloat16)
    b = b.astype(jnp.float32)

    # Resident-W path: grid over rows only; W/bias blocks have constant index
    # so they are fetched once instead of once per row tile.
    resident_bytes = (K * N * 2 + N * 4           # W + bias (single copy)
                      + 2 * tm * K * 2            # x block, double-buffered
                      + 2 * tm * N * out_isz)     # out block, double-buffered
    if resident_bytes <= 24 * 1024 * 1024:
        out = pl.pallas_call(
            _matmul_bias_kernel,
            out_shape=jax.ShapeDtypeStruct((Mp, N), out_dtype),
            grid=(Mp // tm,),
            in_specs=[
                pl.BlockSpec((tm, K), lambda i: (i, 0)),
                pl.BlockSpec((K, N), lambda i: (0, 0)),   # resident weight
                pl.BlockSpec((1, N), lambda i: (0, 0)),   # resident bias
            ],
            out_specs=pl.BlockSpec((tm, N), lambda i: (i, 0)),
            compiler_params=pltpu.CompilerParams(
                dimension_semantics=("parallel",),
                vmem_limit_bytes=VMEM_LIMIT),
        )(x, w, b)
    else:
        # Large N (e.g. big vocab decoder): 2-D grid with rows as the INNER
        # axis so each (K, tn) weight block stays resident across all row
        # tiles and is only re-fetched N//tn times total.
        tn = next(t for t in (512, 256, 128) if N % t == 0)
        out = pl.pallas_call(
            _matmul_bias_kernel,
            out_shape=jax.ShapeDtypeStruct((Mp, N), out_dtype),
            grid=(N // tn, Mp // tm),
            in_specs=[
                pl.BlockSpec((tm, K), lambda j, i: (i, 0)),
                pl.BlockSpec((K, tn), lambda j, i: (0, j)),
                pl.BlockSpec((1, tn), lambda j, i: (0, j)),
            ],
            out_specs=pl.BlockSpec((tm, tn), lambda j, i: (i, j)),
            compiler_params=pltpu.CompilerParams(
                dimension_semantics=("parallel", "parallel"),
                vmem_limit_bytes=VMEM_LIMIT),
        )(x, w, b)
    return out[:M]


# ----------------------------------------------------------------------------
# Pallas kernel: recurrent part of one LSTM layer.
# Grid over chunks of timesteps; h/c carried in VMEM scratch (f32).
# gates_in (bf16) already contains x@W_ih^T + b_ih + b_hh for every timestep.
# PyTorch gate order: i, f, g, o.
# ----------------------------------------------------------------------------
def _lstm_rec_kernel(gates_ref, w_hh_ref, h0_ref, c0_ref,
                     hseq_ref, hn_ref, cn_ref, h_scr, c_scr,
                     *, hidden, chunk, t_valid):
    t = pl.program_id(0)

    @pl.when(t == 0)
    def _():
        h_scr[...] = h0_ref[...]
        c_scr[...] = c0_ref[...]

    w_hh = w_hh_ref[...]  # (H, 4H) bf16, resident across the whole grid

    def step(s, carry):
        h, c = carry                                           # f32 (Bp, H)
        gates = (gates_ref[s].astype(jnp.float32)
                 + jnp.dot(h.astype(w_hh.dtype), w_hh,
                           preferred_element_type=jnp.float32))
        # TODO(synk): on v6e/v7x the sigmoid/tanh chain could run in bf16 for
        # ~2x EUP throughput; kept f32 here (v5e has no bf16 EUP path).
        i = jax.nn.sigmoid(gates[:, 0 * hidden:1 * hidden])
        f = jax.nn.sigmoid(gates[:, 1 * hidden:2 * hidden])
        g = jnp.tanh(gates[:, 2 * hidden:3 * hidden])
        o = jax.nn.sigmoid(gates[:, 3 * hidden:4 * hidden])
        c_new = f * c + i * g                                  # f32 cell state
        h_new = o * jnp.tanh(c_new)
        if t_valid is not None:
            # Ragged-T guard: padded timesteps must not disturb the carry
            # (sigmoid(0)=0.5 on zero-padded gates would corrupt h/c).
            valid = (t * chunk + s) < t_valid
            h_new = jnp.where(valid, h_new, h)
            c_new = jnp.where(valid, c_new, c)
        hseq_ref[s] = h_new.astype(hseq_ref.dtype)             # bf16 writeback
        return h_new, c_new

    h, c = jax.lax.fori_loop(0, chunk, step,
                             (h_scr[...], c_scr[...]), unroll=True)
    h_scr[...] = h
    c_scr[...] = c

    @pl.when(t == pl.num_programs(0) - 1)
    def _():
        hn_ref[...] = h
        cn_ref[...] = c


def _pick_chunk(Tp, Bp, hidden):
    """Largest chunk dividing Tp whose double-buffered gates-in + hseq-out
    blocks fit a conservative VMEM budget (matters on v7x's 64 MiB VMEM)."""
    budget = 8 * 1024 * 1024
    per_step = 2 * Bp * (4 * hidden + hidden) * 2   # 2 bufs, bf16 in+out
    max_chunk = max(1, budget // per_step)
    for c in (16, 8, 4, 2, 1):
        if Tp % c == 0 and c <= max_chunk:
            return c
    return 1


def lstm_recurrent(gates_tm, w_hh_t, h0, c0, t_true):
    """gates_tm: (Tp, Bp, 4H) bf16, w_hh_t: (H, 4H) bf16, h0/c0: (Bp, H) f32."""
    Tp, Bp, G = gates_tm.shape
    H = G // 4
    chunk = _pick_chunk(Tp, Bp, H)
    t_valid = None if t_true == Tp else t_true
    kernel = functools.partial(_lstm_rec_kernel, hidden=H, chunk=chunk,
                               t_valid=t_valid)
    # TODO(synk): on v7x, a leading 'parallel' batch-block grid axis (per-block
    # h/c scratch) would use the second TensorCore when Bp >= 16.
    # TODO(synk): pipeline_mode=pl.Buffered(1) on the constant-index blocks
    # (w_hh/h0/c0) would drop their redundant second VMEM buffer.
    return pl.pallas_call(
        kernel,
        out_shape=(
            jax.ShapeDtypeStruct((Tp, Bp, H), jnp.bfloat16),   # h sequence
            jax.ShapeDtypeStruct((Bp, H), jnp.float32),        # h_n
            jax.ShapeDtypeStruct((Bp, H), jnp.float32),        # c_n
        ),
        grid=(Tp // chunk,),
        in_specs=[
            pl.BlockSpec((chunk, Bp, G), lambda t: (t, 0, 0)),  # gates chunk
            pl.BlockSpec((H, G), lambda t: (0, 0)),             # W_hh^T
            pl.BlockSpec((Bp, H), lambda t: (0, 0)),             # h0
            pl.BlockSpec((Bp, H), lambda t: (0, 0)),             # c0
        ],
        out_specs=[
            pl.BlockSpec((chunk, Bp, H), lambda t: (t, 0, 0)),   # h sequence
            pl.BlockSpec((Bp, H), lambda t: (0, 0)),             # h_n
            pl.BlockSpec((Bp, H), lambda t: (0, 0)),             # c_n
        ],
        scratch_shapes=[pltpu.VMEM((Bp, H), jnp.float32),
                        pltpu.VMEM((Bp, H), jnp.float32)],
        compiler_params=pltpu.CompilerParams(
            dimension_semantics=("arbitrary",),   # sequential: state carry
            vmem_limit_bytes=VMEM_LIMIT),
    )(gates_tm, w_hh_t, h0, c0)


# ----------------------------------------------------------------------------
# Forward pass (matches RNNLanguageModel.forward, eval-mode)
# ----------------------------------------------------------------------------
def rnn_language_model_forward(params, input_sequence, initial_states=None):
    if input_sequence is None:
        raise ValueError('No value for the input sequence!')
    # model_emb: embedding lookup (XLA glue); table stored bf16.
    emb = jnp.take(params['emb'], input_sequence, axis=0)       # (B, T, 256) bf16
    B, T, _ = emb.shape
    Bp = _round_up(max(B, 8), 8)                                # sublane padding
    Tp = _round_up(T, 8)                                        # keep chunk >= 8

    if initial_states is None:
        h0 = jnp.zeros((NUM_LAYERS, Bp, HIDDEN), jnp.float32)
        c0 = jnp.zeros((NUM_LAYERS, Bp, HIDDEN), jnp.float32)
    else:
        h0_in, c0_in = initial_states
        pad = ((0, 0), (0, Bp - h0_in.shape[1]), (0, 0))
        h0 = jnp.pad(h0_in.astype(jnp.float32), pad)
        c0 = jnp.pad(c0_in.astype(jnp.float32), pad)

    x = jnp.transpose(emb, (1, 0, 2))                           # (T, B, 256)
    x = jnp.pad(x, ((0, Tp - T), (0, Bp - B), (0, 0)))          # (Tp, Bp, 256)

    hs, cs = [], []
    for layer in range(NUM_LAYERS):
        d_in = x.shape[-1]
        # Hoisted, grid-parallel input projection over all Tp*Bp rows.
        # Gates stored in bf16; in-kernel f32 h@W_hh accumulation restores
        # precision before the nonlinearities.
        gates_flat = matmul_bias(x.reshape(Tp * Bp, d_in),
                                 params[f'w_ih_{layer}'],
                                 params[f'b_{layer}'],
                                 out_dtype=jnp.bfloat16)        # (Tp*Bp, 4H)
        gates_tm = gates_flat.reshape(Tp, Bp, 4 * HIDDEN)
        x, hn, cn = lstm_recurrent(gates_tm, params[f'w_hh_{layer}'],
                                   h0[layer], c0[layer], T)
        hs.append(hn[:B])
        cs.append(cn[:B])
        # TODO(synk): nn.LSTM dropout=0.2 acts only between layers in training
        # mode; eval-mode semantics implemented, so no dropout here.

    lstm_out = jnp.transpose(x[:T], (1, 0, 2))[:B]              # (B, T, 512) bf16
    flat = lstm_out.reshape(B * T, HIDDEN)

    # Decoder: pad vocab to a multiple of 128 for lane-dense output stores.
    w_dec_t = params['w_dec_t']                                 # (512, V) bf16
    b_dec = params['b_dec']                                     # (1, V) f32
    V = w_dec_t.shape[1]
    Vp = _round_up(V, 128)
    if Vp != V:
        w_dec_t = jnp.pad(w_dec_t, ((0, 0), (0, Vp - V)))
        b_dec = jnp.pad(b_dec, ((0, 0), (0, Vp - V)))
    logits = matmul_bias(flat, w_dec_t, b_dec,
                         out_dtype=jnp.float32)                 # (B*T, Vp) f32
    fc_out = logits[:, :V].reshape(B, T, V)

    hn_all = jnp.stack(hs, axis=0)                              # (2, B, 512)
    cn_all = jnp.stack(cs, axis=0)                              # (2, B, 512)
    return fc_out, (hn_all, cn_all)


# ----------------------------------------------------------------------------
# Deterministic parameter construction (weights + embedding stored bf16 for
# the MXU / gather traffic; biases in f32).
# ----------------------------------------------------------------------------
def make_params(key, vocab_size):
    ks = jax.random.split(key, 12)
    scale = 0.05
    params = {
        'emb': (jax.random.normal(ks[0], (vocab_size, EMB), jnp.float32)
                * scale).astype(jnp.bfloat16),
        'w_dec_t': (jax.random.normal(ks[1], (HIDDEN, vocab_size),
                                      jnp.float32) * scale).astype(jnp.bfloat16),
        'b_dec': jax.random.normal(ks[2], (1, vocab_size), jnp.float32) * scale,
    }
    k_idx = 3
    for layer in range(NUM_LAYERS):
        d_in = EMB if layer == 0 else HIDDEN
        # PyTorch stores W_ih: (4H, d_in), W_hh: (4H, H); pre-transpose for x @ W^T.
        w_ih = jax.random.normal(ks[k_idx], (4 * HIDDEN, d_in), jnp.float32) * scale
        w_hh = jax.random.normal(ks[k_idx + 1], (4 * HIDDEN, HIDDEN), jnp.float32) * scale
        b_ih = jax.random.normal(ks[k_idx + 2], (4 * HIDDEN,), jnp.float32) * scale
        b_hh = jax.random.normal(ks[k_idx + 3], (4 * HIDDEN,), jnp.float32) * scale
        k_idx += 4
        params[f'w_ih_{layer}'] = w_ih.T.astype(jnp.bfloat16)    # (d_in, 4H)
        params[f'w_hh_{layer}'] = w_hh.T.astype(jnp.bfloat16)    # (H, 4H)
        params[f'b_{layer}'] = (b_ih + b_hh).reshape(1, 4 * HIDDEN)
    return params


if __name__ == "__main__":
    key = jax.random.PRNGKey(0)
    vocab_size = 32
    batch, seq_len = 2, 8

    params = make_params(key, vocab_size)
    input_sequence = jax.random.randint(
        jax.random.PRNGKey(1), (batch, seq_len), 0, vocab_size, dtype=jnp.int32)

    fc_out, (hn, cn) = rnn_language_model_forward(params, input_sequence)
    jax.block_until_ready((fc_out, hn, cn))

    assert fc_out.shape == (batch, seq_len, vocab_size)
    assert hn.shape == (NUM_LAYERS, batch, HIDDEN)
    assert cn.shape == (NUM_LAYERS, batch, HIDDEN)
    print("KERNEL_OK")
</pallas_src>

<mosaic_0001>
module attributes {stable_mosaic.version = 11 : i64} {
  func.func @_matmul_bias_kernel(%arg0: i32, %arg1: memref<64x256xbf16, #tpu.memory_space<vmem>>, %arg2: memref<256x2048xbf16, #tpu.memory_space<vmem>>, %arg3: memref<1x2048xf32, #tpu.memory_space<vmem>>, %arg4: memref<64x2048xbf16, #tpu.memory_space<vmem>>) attributes {dimension_semantics = [#tpu.dimension_semantics<parallel>], iteration_bounds = array<i64: 1>, scalar_prefetch = 0 : i64, scratch_operands = 0 : i64, tpu.core_type = #tpu.core_type<tc>, window_params = [{transform_indices = @transform_0, window_bounds = array<i64: 64, 256>}, {pipeline_mode = #tpu.pipeline_mode<synchronous>, transform_indices = @transform_1, window_bounds = array<i64: 256, 2048>}, {pipeline_mode = #tpu.pipeline_mode<synchronous>, transform_indices = @transform_2, window_bounds = array<i64: 1, 2048>}, {transform_indices = @transform_3, window_bounds = array<i64: 64, 2048>}]} {
    %c0 = arith.constant 0 : index
    %c0_0 = arith.constant 0 : index
    %0 = vector.load %arg1[%c0, %c0_0] : memref<64x256xbf16, #tpu.memory_space<vmem>>, vector<64x256xbf16>
    %c0_1 = arith.constant 0 : index
    %c0_2 = arith.constant 0 : index
    %1 = vector.load %arg2[%c0_1, %c0_2] : memref<256x2048xbf16, #tpu.memory_space<vmem>>, vector<256x2048xbf16>
    %cst = arith.constant dense<0.000000e+00> : vector<64x2048xf32>
    %2 = tpu.matmul %0, %1, %cst {dimension_numbers = #tpu.dot_dimension_numbers<[1], [0], [0], [1], [0, 0, 1, 1], [], []>} : vector<64x256xbf16>, vector<256x2048xbf16>, vector<64x2048xf32> -> vector<64x2048xf32>
    %c0_3 = arith.constant 0 : index
    %c0_4 = arith.constant 0 : index
    %3 = vector.load %arg3[%c0_3, %c0_4] : memref<1x2048xf32, #tpu.memory_space<vmem>>, vector<1x2048xf32>
    %4 = vector.broadcast %3 : vector<1x2048xf32> to vector<64x2048xf32>
    %5 = arith.addf %2, %4 : vector<64x2048xf32>
    %6 = arith.truncf %5 : vector<64x2048xf32> to vector<64x2048xbf16>
    %c0_5 = arith.constant 0 : index
    %c0_6 = arith.constant 0 : index
    %7 = vector.load %arg4[%c0_5, %c0_6] : memref<64x2048xbf16, #tpu.memory_space<vmem>>, vector<64x2048xbf16>
    tpu.vector_store %arg4[%c0_5, %c0_6], %6 {strides = array<i32>} : memref<64x2048xbf16, #tpu.memory_space<vmem>>, vector<64x2048xbf16>,
    return
  }
  func.func @transform_0(%arg0: i32) -> (i32, i32) {
    %c0_i32 = arith.constant 0 : i32
    %c0_i32_0 = arith.constant 0 : i32
    return %arg0, %c0_i32 : i32, i32
  }
  func.func @transform_1(%arg0: i32) -> (i32, i32) {
    %c0_i32 = arith.constant 0 : i32
    %c0_i32_0 = arith.constant 0 : i32
    %c0_i32_1 = arith.constant 0 : i32
    return %c0_i32, %c0_i32_0 : i32, i32
  }
  func.func @transform_2(%arg0: i32) -> (i32, i32) {
    %c0_i32 = arith.constant 0 : i32
    %c0_i32_0 = arith.constant 0 : i32
    %c0_i32_1 = arith.constant 0 : i32
    return %c0_i32, %c0_i32_0 : i32, i32
  }
  func.func @transform_3(%arg0: i32) -> (i32, i32) {
    %c0_i32 = arith.constant 0 : i32
    %c0_i32_0 = arith.constant 0 : i32
    return %arg0, %c0_i32 : i32, i32
  }
}

</mosaic_0001>

<bundles_post_ra>
// kernel: tpu_custom_call.1
= control target key start
LH: loop header
LB: loop body
LE: loop exit
PB: predicated region body
PF: predicated region fallthrough
CT: control target
= control target key end

     0   :  { %8 = vsyncpa [#allocation3], 0  ;;  %s3654_s0 = inlined_call_operand.hbm [shape: bf16[64,256], index: 0, kind: input, shape index: {}]   ;;  %s3655_s1 = inlined_call_operand.hbm [shape: bf16[256,2048], index: 1, kind: input, shape index: {}]   ;;  %s3656_s2 = inlined_call_operand.hbm [shape: f32[1,2048], index: 2, kind: input, shape index: {}]   ;;  %s3657_s3 = inlined_call_operand.hbm [shape: bf16[64,2048], index: 3, kind: output, shape index: {}]  }
   0x1   :  { %9 = vsyncpa [#allocation6], 0 }
   0x2   :  { %10 = vsyncpa [#allocation4], 0  ;;  %s3286_s12 = smov [#allocation5]   ;;  %s3192_s16 = scalar_lea.hbm %s3655_s1, 32768 }
   0x3   :  { %s28_s13 = sshll.u32 %s3286_s12, 4  ;;  %p3193_p0 = scmp.ne.s32.totalorder %s3655_s1, %s3192_s16  ;;  %s29_s13 = int_to_ptr.vmem [resolvable:$true] %s28_s13 }
   0x4   :  { %p3196_p1 = scmp.lt.u32.totalorder %s3192_s16, %s3655_s1 }
   0x6   :  { %p3198_p2 = pnand %p3196_p1, %p3193_p0 }
   0x8   :  { %3201 = shalt.err (!%p3198_p2)
}
   0x9   :  { %s3202_s21 = scalar_lea.vmem %s29_s13, 32768  ;;  %p3207_p4 = scmp.lt.s32.totalorder %s29_s13, %s29_s13 }
   0xa   :  { %p3203_p3 = scmp.ne.s32.totalorder %s29_s13, %s3202_s21  ;;  %p3208_p5 = scmp.lt.s32.totalorder %s3202_s21, %s3202_s21 }
   0xc   :  { %p3209_p6 = por %p3208_p5, %p3207_p4 }
   0xe   :  { %p3210_p7 = pnand %p3209_p6, %p3203_p3 }
  0x10   :  { %3213 = shalt.err (!%p3210_p7)
}
  0x11   :  { %s3287_s22 = smov 1024   ;;  %s3288_s23 = smov 64  }
  0x12   :  { %34 = dma.hbm_to_vmem [thread:$0]  %s3655_s1, 32768, %s29_s13, [#allocation6], %s3287_s22, %s3287_s22, %s3288_s23  }
  0x13   :  { %s3289_s26 = smov [#allocation2]   ;;  %s3214_s30 = scalar_lea.hbm %s3654_s0, 1024 }
  0x14   :  { %s16_s27 = sshll.u32 %s3289_s26, 4  ;;  %p3215_p8 = scmp.ne.s32.totalorder %s3654_s0, %s3214_s30  ;;  %s17_s27 = int_to_ptr.vmem [resolvable:$true] %s16_s27 }
  0x15   :  { %p3218_p9 = scmp.lt.u32.totalorder %s3214_s30, %s3654_s0 }
  0x17   :  { %p3220_p10 = pnand %p3218_p9, %p3215_p8 }
  0x19   :  { %3223 = shalt.err (!%p3220_p10)
}
  0x1a   :  { %s3224_s8 = scalar_lea.vmem %s17_s27, 1024  ;;  %p3229_p12 = scmp.lt.s32.totalorder %s17_s27, %s17_s27 }
  0x1b   :  { %p3225_p11 = scmp.ne.s32.totalorder %s17_s27, %s3224_s8  ;;  %p3230_p13 = scmp.lt.s32.totalorder %s3224_s8, %s3224_s8 }
  0x1d   :  { %p3231_p0 = por %p3230_p13, %p3229_p12 }
  0x1f   :  { %p3232_p1 = pnand %p3231_p0, %p3225_p11 }
  0x21   :  { %3235 = shalt.err (!%p3232_p1)
}
  0x22   :  { %s3290_s1 = smov 128   ;;  %s3291_s9 = smov 8  }
  0x23   :  { %22 = dma.hbm_to_vmem [thread:$0]  %s3654_s0, 1024, %s17_s27, [#allocation3], %s3290_s1, %s3290_s1, %s3291_s9  }
  0x24   :  { %s3292_s12 = smov [#allocation7]   ;;  %s3236_s16 = scalar_lea.hbm %s3656_s2, 256 }
  0x25   :  { %s41_s13 = sshll.u32 %s3292_s12, 4  ;;  %p3237_p2 = scmp.ne.s32.totalorder %s3656_s2, %s3236_s16  ;;  %s42_s13 = int_to_ptr.vmem [resolvable:$true] %s41_s13 }
  0x26   :  { %p3240_p3 = scmp.lt.u32.totalorder %s3236_s16, %s3656_s2 }
  0x28   :  { %p3242_p4 = pnand %p3240_p3, %p3237_p2 }
  0x2a   :  { %3245 = shalt.err (!%p3242_p4)
}
  0x2b   :  { %s3246_s21 = scalar_lea.vmem %s42_s13, 256  ;;  %p3251_p6 = scmp.lt.s32.totalorder %s42_s13, %s42_s13 }
  0x2c   :  { %p3247_p5 = scmp.ne.s32.totalorder %s42_s13, %s3246_s21  ;;  %p3252_p7 = scmp.lt.s32.totalorder %s3246_s21, %s3246_s21 }
  0x2e   :  { %p3253_p8 = por %p3252_p7, %p3251_p6 }
  0x30   :  { %p3254_p9 = pnand %p3253_p8, %p3247_p5 }
  0x32   :  { %3257 = shalt.err (!%p3254_p9)
}
  0x33   :  { %44 = dma.hbm_to_vmem [thread:$0]  %s3656_s2, 256, %s42_s13, [#allocation6]  }
  0x34   :  { %3280 = dma.done.wait [#allocation3], 1024  }
  0x35   :  { %3281 = vsyncadd [#allocation3], 4294966272 }
  0x36   :  { %3282 = dma.done.wait [#allocation6], 33024  }
  0x37   :  { %3283 = vsyncadd [#allocation6], 4294934272  ;;  %v62_v0 = vld [vmem:[#allocation5] sm:$0xff]  ;;  %v63_v2 = vld [vmem:[#allocation5 + $0x8] sm:$0xff]  ;;  %s3293_s2 = smov [#allocation8]  }
  0x38   :  { %v70_v1 = vld [vmem:[#allocation5 + $0x40] sm:$0xff]  ;;  %v71_v4 = vld [vmem:[#allocation5 + $0x48] sm:$0xff]  ;;  %s2759_s25 = sshll.u32 %s3293_s2, 4  ;;  %s2760_s25 = int_to_ptr.vmem [resolvable:$true] %s2759_s25 }
  0x39   :  { %v2781_v3 = vcombine.high %v62_v0, %v70_v1  ;;  %v2780_v5 = vcombine.low %v62_v0, %v70_v1  ;;  %v78_v6 = vld [vmem:[#allocation5 + $0x80] sm:$0xff]  ;;  %v2783_v8 = vcombine.high %v63_v2, %v71_v4  ;;  %v2782_v9 = vcombine.low %v63_v2, %v71_v4  ;;  %v79_v11 = vld [vmem:[#allocation5 + $0x88] sm:$0xff]  ;;  %s3258_s26 = scalar_lea.vmem %s2760_s25, 8192  ;;  %p3263_p11 = scmp.lt.s32.totalorder %s2760_s25, %s2760_s25 }
  0x3a   :  { %v86_v7 = vld [vmem:[#allocation5 + $0xc0] sm:$0xff]  ;;  %v87_v12 = vld [vmem:[#allocation5 + $0xc8] sm:$0xff]  ;;  %p3259_p10 = scmp.ne.s32.totalorder %s2760_s25, %s3258_s26  ;;  %p3264_p12 = scmp.lt.s32.totalorder %s3258_s26, %s3258_s26 }
  0x3b   :  { %v2797_v10 = vcombine.high %v78_v6, %v86_v7  ;;  %v94_v13 = vld [vmem:[#allocation5 + $0x100] sm:$0xff]  ;;  %1722 = vmatprep.subr.bf16.mxu0 %v2781_v3  ;;  %v2799_v14 = vcombine.high %v79_v11, %v87_v12  ;;  %v95_v16 = vld [vmem:[#allocation5 + $0x108] sm:$0xff]  ;;  %1795 = vmatprep.subr.bf16.mxu1 %v2783_v8  ;;  %v2796_v18 = vcombine.low %v78_v6, %v86_v7 }
  0x3c   :  { %v102_v15 = vld [vmem:[#allocation5 + $0x140] sm:$0xff]  ;;  %v103_v17 = vld [vmem:[#allocation5 + $0x148] sm:$0xff]  ;;  %1723 = vmatpush1.bf16.msra.mxu0 %v2780_v5  ;;  %1796 = vmatpush1.bf16.msra.mxu1 %v2782_v9  ;;  %v2798_v19 = vcombine.low %v79_v11, %v87_v12  ;;  %p3265_p13 = por %p3264_p12, %p3263_p11 }
  0x3d   :  { %1724 = vmatprep.subr.bf16.mxu0 %v2797_v10  ;;  %v2813_v20 = vcombine.high %v94_v13, %v102_v15  ;;  %1797 = vmatprep.subr.bf16.mxu1 %v2799_v14  ;;  %v2815_v21 = vcombine.high %v95_v16, %v103_v17  ;;  %v110_v22 = vld [vmem:[#allocation5 + $0x180] sm:$0xff]  ;;  %v111_v24 = vld [vmem:[#allocation5 + $0x188] sm:$0xff]  ;;  %v2812_v26 = vcombine.low %v94_v13, %v102_v15 }
  0x3e   :  { %v118_v23 = vld [vmem:[#allocation5 + $0x1c0] sm:$0xff]  ;;  %v119_v25 = vld [vmem:[#allocation5 + $0x1c8] sm:$0xff]  ;;  %v2814_v27 = vcombine.low %v95_v16, %v103_v17  ;;  %p3266_p0 = pnand %p3265_p13, %p3259_p10 }
  0x3f   :  { %v2829_v28 = vcombine.high %v110_v22, %v118_v23  ;;  %v2831_v29 = vcombine.high %v111_v24, %v119_v25  ;;  %v126_v30 = vld [vmem:[#allocation5 + $0x200] sm:$0xff]  ;;  %v127_v32 = vld [vmem:[#allocation5 + $0x208] sm:$0xff]  ;;  %v2828_v34 = vcombine.low %v110_v22, %v118_v23  ;;  %v2830_v35 = vcombine.low %v111_v24, %v119_v25 }
  0x40   :  { %1725 = vmatpush1.bf16.msra.mxu0 %v2796_v18  ;;  %1798 = vmatpush1.bf16.msra.mxu1 %v2798_v19  ;;  %v134_v31 = vld [vmem:[#allocation5 + $0x240] sm:$0xff]  ;;  %v135_v33 = vld [vmem:[#allocation5 + $0x248] sm:$0xff] }
  0x41   :  { %1726 = vmatprep.subr.bf16.mxu0 %v2813_v20  ;;  %1799 = vmatprep.subr.bf16.mxu1 %v2815_v21  ;;  %v2845_v36 = vcombine.high %v126_v30, %v134_v31  ;;  %v2847_v37 = vcombine.high %v127_v32, %v135_v33  ;;  %v142_v38 = vld [vmem:[#allocation5 + $0x280] sm:$0xff]  ;;  %v143_v40 = vld [vmem:[#allocation5 + $0x288] sm:$0xff]  ;;  %v2844_v42 = vcombine.low %v126_v30, %v134_v31 }
  0x42   :  { %v150_v39 = vld [vmem:[#allocation5 + $0x2c0] sm:$0xff]  ;;  %v151_v41 = vld [vmem:[#allocation5 + $0x2c8] sm:$0xff]  ;;  %v2846_v43 = vcombine.low %v127_v32, %v135_v33 }
  0x43   :  { %v2861_v44 = vcombine.high %v142_v38, %v150_v39  ;;  %v2863_v45 = vcombine.high %v143_v40, %v151_v41  ;;  %v158_v46 = vld [vmem:[#allocation5 + $0x300] sm:$0xff]  ;;  %v159_v48 = vld [vmem:[#allocation5 + $0x308] sm:$0xff]  ;;  %v2860_v50 = vcombine.low %v142_v38, %v150_v39  ;;  %v2862_v51 = vcombine.low %v143_v40, %v151_v41 }
  0x44   :  { %1727 = vmatpush1.bf16.msra.mxu0 %v2812_v26  ;;  %1800 = vmatpush1.bf16.msra.mxu1 %v2814_v27  ;;  %v166_v47 = vld [vmem:[#allocation5 + $0x340] sm:$0xff]  ;;  %v167_v49 = vld [vmem:[#allocation5 + $0x348] sm:$0xff] }
  0x45   :  { %1728 = vmatprep.subr.bf16.mxu0 %v2829_v28  ;;  %1801 = vmatprep.subr.bf16.mxu1 %v2831_v29  ;;  %v2877_v52 = vcombine.high %v158_v46, %v166_v47  ;;  %v2879_v53 = vcombine.high %v159_v48, %v167_v49  ;;  %v174_v54 = vld [vmem:[#allocation5 + $0x380] sm:$0xff]  ;;  %v175_v57 = vld [vmem:[#allocation5 + $0x388] sm:$0xff]  ;;  %v2876_v59 = vcombine.low %v158_v46, %v166_v47 }
  0x46   :  { %v182_v55 = vld [vmem:[#allocation5 + $0x3c0] sm:$0xff]  ;;  %v183_v58 = vld [vmem:[#allocation5 + $0x3c8] sm:$0xff]  ;;  %v2878_v60 = vcombine.low %v159_v48, %v167_v49 }
  0x47   :  { %v3353_v56 = vld [vmem:[#allocation2 + $0x4] ss:$8 sps:$4 sm:$0xff]   ;;  %v2893_v61 = vcombine.high %v174_v54, %v182_v55  ;;  %v2895_v62 = vcombine.high %v175_v57, %v183_v58  ;;  %v2892_v3 = vcombine.low %v174_v54, %v182_v55  ;;  %v2894_v4 = vcombine.low %v175_v57, %v183_v58 }
  0x48   :  { %1729 = vmatpush1.bf16.msra.mxu0 %v2828_v34  ;;  %1802 = vmatpush1.bf16.msra.mxu1 %v2830_v35  ;;  %v190_v63 = vld [vmem:[#allocation5 + $0x400] sm:$0xff]  ;;  %v191_v1 = vld [vmem:[#allocation5 + $0x408] sm:$0xff] }
  0x49   :  { %1730 = vmatprep.subr.bf16.mxu0 %v2845_v36  ;;  %1803 = vmatprep.subr.bf16.mxu1 %v2847_v37  ;;  %v198_v0 = vld [vmem:[#allocation5 + $0x440] sm:$0xff]  ;;  %v199_v2 = vld [vmem:[#allocation5 + $0x448] sm:$0xff] }
  0x4a   :  { %1754 = vmatprep.mubr.bf16.mxu0 %v3353_v56  ;;  %1827 = vmatprep.mubr.bf16.mxu1 %v3353_v56  ;;  %v2909_v5 = vcombine.high %v190_v63, %v198_v0  ;;  %v2911_v6 = vcombine.high %v191_v1, %v199_v2  ;;  %v206_v7 = vld [vmem:[#allocation5 + $0x480] sm:$0xff]  ;;  %v207_v9 = vld [vmem:[#allocation5 + $0x488] sm:$0xff]  ;;  %v2908_v11 = vcombine.low %v190_v63, %v198_v0  ;;  %v64_v0 = vld [vmem:[#allocation5 + $0x10] sm:$0xff] }
  0x4b   :  { %v214_v8 = vld [vmem:[#allocation5 + $0x4c0] sm:$0xff]  ;;  %v215_v10 = vld [vmem:[#allocation5 + $0x4c8] sm:$0xff]  ;;  %v2910_v12 = vcombine.low %v191_v1, %v199_v2  ;;  %v72_v1 = vld [vmem:[#allocation5 + $0x50] sm:$0xff] }
  0x4c   :  { %1731 = vmatpush1.bf16.msra.mxu0 %v2844_v42  ;;  %1804 = vmatpush1.bf16.msra.mxu1 %v2846_v43  ;;  %v2925_v13 = vcombine.high %v206_v7, %v214_v8  ;;  %v2927_v14 = vcombine.high %v207_v9, %v215_v10  ;;  %v222_v15 = vld [vmem:[#allocation5 + $0x500] sm:$0xff]  ;;  %v223_v17 = vld [vmem:[#allocation5 + $0x508] sm:$0xff]  ;;  %v2924_v19 = vcombine.low %v206_v7, %v214_v8  ;;  %v65_v2 = vld [vmem:[#allocation5 + $0x18] sm:$0xff] }
  0x4d   :  { %1732 = vmatprep.subr.bf16.mxu0 %v2861_v44  ;;  %1805 = vmatprep.subr.bf16.mxu1 %v2863_v45  ;;  %v230_v16 = vld [vmem:[#allocation5 + $0x540] sm:$0xff]  ;;  %v231_v18 = vld [vmem:[#allocation5 + $0x548] sm:$0xff]  ;;  %v2926_v20 = vcombine.low %v207_v9, %v215_v10  ;;  %v80_v8 = vld [vmem:[#allocation5 + $0x90] sm:$0xff] }
  0x4e   :  { %v2941_v21 = vcombine.high %v222_v15, %v230_v16  ;;  %v2943_v22 = vcombine.high %v223_v17, %v231_v18  ;;  %v238_v23 = vld [vmem:[#allocation5 + $0x580] sm:$0xff]  ;;  %v239_v25 = vld [vmem:[#allocation5 + $0x588] sm:$0xff]  ;;  %v2940_v27 = vcombine.low %v222_v15, %v230_v16  ;;  %v2942_v28 = vcombine.low %v223_v17, %v231_v18  ;;  %v88_v9 = vld [vmem:[#allocation5 + $0xd0] sm:$0xff] }
  0x4f   :  { %v246_v24 = vld [vmem:[#allocation5 + $0x5c0] sm:$0xff]  ;;  %v247_v26 = vld [vmem:[#allocation5 + $0x5c8] sm:$0xff]  ;;  %v2801_v15 = vcombine.high %v80_v8, %v88_v9  ;;  %v96_v17 = vld [vmem:[#allocation5 + $0x110] sm:$0xff] }
  0x50   :  { %1733 = vmatpush1.bf16.msra.mxu0 %v2860_v50  ;;  %1806 = vmatpush1.bf16.msra.mxu1 %v2862_v51  ;;  %v2957_v29 = vcombine.high %v238_v23, %v246_v24  ;;  %v2959_v30 = vcombine.high %v239_v25, %v247_v26  ;;  %v254_v31 = vld [vmem:[#allocation5 + $0x600] sm:$0xff]  ;;  %v255_v33 = vld [vmem:[#allocation5 + $0x608] sm:$0xff]  ;;  %v2956_v35 = vcombine.low %v238_v23, %v246_v24  ;;  %v104_v18 = vld [vmem:[#allocation5 + $0x150] sm:$0xff] }
  0x51   :  { %1734 = vmatprep.subr.bf16.mxu0 %v2877_v52  ;;  %1807 = vmatprep.subr.bf16.mxu1 %v2879_v53  ;;  %v262_v32 = vld [vmem:[#allocation5 + $0x640] sm:$0xff]  ;;  %v263_v34 = vld [vmem:[#allocation5 + $0x648] sm:$0xff]  ;;  %v2958_v36 = vcombine.low %v239_v25, %v247_v26  ;;  %v2817_v24 = vcombine.high %v96_v17, %v104_v18  ;;  %v112_v26 = vld [vmem:[#allocation5 + $0x190] sm:$0xff] }
  0x52   :  { %v2973_v37 = vcombine.high %v254_v31, %v262_v32  ;;  %v2975_v38 = vcombine.high %v255_v33, %v263_v34  ;;  %v270_v39 = vld [vmem:[#allocation5 + $0x680] sm:$0xff]  ;;  %v271_v41 = vld [vmem:[#allocation5 + $0x688] sm:$0xff]  ;;  %v2972_v43 = vcombine.low %v254_v31, %v262_v32  ;;  %v2974_v44 = vcombine.low %v255_v33, %v263_v34 }
  0x53   :  { %v278_v40 = vld [vmem:[#allocation5 + $0x6c0] sm:$0xff]  ;;  %v279_v42 = vld [vmem:[#allocation5 + $0x6c8] sm:$0xff]  ;;  %v2816_v31 = vcombine.low %v96_v17, %v104_v18  ;;  %v208_v17 = vld [vmem:[#allocation5 + $0x490] sm:$0xff] }
  0x54   :  { %1735 = vmatpush1.bf16.msra.mxu0 %v2876_v59  ;;  %1808 = vmatpush1.bf16.msra.mxu1 %v2878_v60  ;;  %v2989_v45 = vcombine.high %v270_v39, %v278_v40  ;;  %v2991_v46 = vcombine.high %v271_v41, %v279_v42  ;;  %v286_v47 = vld [vmem:[#allocation5 + $0x700] sm:$0xff]  ;;  %v287_v49 = vld [vmem:[#allocation5 + $0x708] sm:$0xff]  ;;  %v2988_v51 = vcombine.low %v270_v39, %v278_v40  ;;  %v137_v39 = vld [vmem:[#allocation5 + $0x258] sm:$0xff] }
  0x55   :  { %1736 = vmatprep.subr.bf16.mxu0 %v2893_v61  ;;  %1809 = vmatprep.subr.bf16.mxu1 %v2895_v62  ;;  %v294_v48 = vld [vmem:[#allocation5 + $0x740] sm:$0xff]  ;;  %v295_v50 = vld [vmem:[#allocation5 + $0x748] sm:$0xff]  ;;  %v2990_v52 = vcombine.low %v271_v41, %v279_v42  ;;  %v216_v18 = vld [vmem:[#allocation5 + $0x4d0] sm:$0xff] }
  0x56   :  { %v3005_v53 = vcombine.high %v286_v47, %v294_v48  ;;  %v3007_v54 = vcombine.high %v287_v49, %v295_v50  ;;  %v302_v55 = vld [vmem:[#allocation5 + $0x780] sm:$0xff]  ;;  %v303_v58 = vld [vmem:[#allocation5 + $0x788] sm:$0xff]  ;;  %v3004_v60 = vcombine.low %v286_v47, %v294_v48  ;;  %v3006_v61 = vcombine.low %v287_v49, %v295_v50  ;;  %v153_v47 = vld [vmem:[#allocation5 + $0x2d8] sm:$0xff] }
  0x57   :  { %v310_v57 = vld [vmem:[#allocation5 + $0x7c0] sm:$0xff]  ;;  %v311_v59 = vld [vmem:[#allocation5 + $0x7c8] sm:$0xff] }
  0x58   :  { %1737 = vmatpush1.bf16.msra.mxu0 %v2892_v3  ;;  %1810 = vmatpush1.bf16.msra.mxu1 %v2894_v4  ;;  %v3021_v62 = vcombine.high %v302_v55, %v310_v57  ;;  %v3023_v63 = vcombine.high %v303_v58, %v311_v59  ;;  %v73_v3 = vld [vmem:[#allocation5 + $0x58] sm:$0xff]  ;;  %v3020_v4 = vcombine.low %v302_v55, %v310_v57  ;;  %v3357_v10 = vld [vmem:[#allocation2] ss:$8 sps:$4 sm:$0xff]  }
  0x59   :  { %1738 = vmatprep.subr.bf16.mxu0 %v2909_v5  ;;  %1811 = vmatprep.subr.bf16.mxu1 %v2911_v6  ;;  %v3022_v5 = vcombine.low %v303_v58, %v311_v59  ;;  %v2785_v6 = vcombine.high %v64_v0, %v72_v1  ;;  %v2787_v7 = vcombine.high %v65_v2, %v73_v3  ;;  %v3373_v48 = vld [vmem:[#allocation2 + $0x20] ss:$8 sps:$4 sm:$0xff]   ;;  %v3375_v55 = vld [vmem:[#allocation2 + $0x34] ss:$8 sps:$4 sm:$0xff]  }
  0x5a   :  { %v161_v57 = vld [vmem:[#allocation5 + $0x318] sm:$0xff] }
  0x5b   :  { %v169_v58 = vld [vmem:[#allocation5 + $0x358] sm:$0xff] }
  0x5c   :  { %1739 = vmatpush1.bf16.msra.mxu0 %v2908_v11  ;;  %1812 = vmatpush1.bf16.msra.mxu1 %v2910_v12  ;;  %v81_v11 = vld [vmem:[#allocation5 + $0x98] sm:$0xff] }
  0x5d   :  { %1740 = vmatprep.subr.bf16.mxu0 %v2925_v13  ;;  %1813 = vmatprep.subr.bf16.mxu1 %v2927_v14  ;;  %v89_v12 = vld [vmem:[#allocation5 + $0xd8] sm:$0xff]  ;;  %v2784_v13 = vcombine.low %v64_v0, %v72_v1  ;;  %v2786_v14 = vcombine.low %v65_v2, %v73_v3  ;;  %v184_v0 = vld [vmem:[#allocation5 + $0x3d0] sm:$0xff] }
  0x5e   :  { %v2803_v16 = vcombine.high %v81_v11, %v89_v12  ;;  %v2802_v23 = vcombine.low %v81_v11, %v89_v12  ;;  %v177_v1 = vld [vmem:[#allocation5 + $0x398] sm:$0xff] }
  0x5f   :  { %v185_v2 = vld [vmem:[#allocation5 + $0x3d8] sm:$0xff] }
  0x60   :  { %1741 = vmatpush1.bf16.msra.mxu0 %v2924_v19  ;;  %1814 = vmatpush1.bf16.msra.mxu1 %v2926_v20  ;;  %v3359_v19 = vld [vmem:[#allocation2 + $0x14] ss:$8 sps:$4 sm:$0xff]   ;;  %v3381_v3 = vld [vmem:[#allocation2 + $0x30] ss:$8 sps:$4 sm:$0xff]  }
  0x61   :  { %1742 = vmatprep.subr.bf16.mxu0 %v2941_v21  ;;  %1815 = vmatprep.subr.bf16.mxu1 %v2943_v22  ;;  %v97_v20 = vld [vmem:[#allocation5 + $0x118] sm:$0xff]  ;;  %v2800_v22 = vcombine.low %v80_v8, %v88_v9  ;;  %v192_v8 = vld [vmem:[#allocation5 + $0x410] sm:$0xff] }
  0x62   :  { %v105_v21 = vld [vmem:[#allocation5 + $0x158] sm:$0xff]  ;;  %v200_v9 = vld [vmem:[#allocation5 + $0x450] sm:$0xff] }
  0x63   :  { %v2819_v25 = vcombine.high %v97_v20, %v105_v21  ;;  %v2818_v32 = vcombine.low %v97_v20, %v105_v21  ;;  %v193_v11 = vld [vmem:[#allocation5 + $0x418] sm:$0xff] }
  0x64   :  { %1743 = vmatpush1.bf16.msra.mxu0 %v2940_v27  ;;  %1816 = vmatpush1.bf16.msra.mxu1 %v2942_v28  ;;  %v120_v27 = vld [vmem:[#allocation5 + $0x1d0] sm:$0xff]  ;;  %v113_v28 = vld [vmem:[#allocation5 + $0x198] sm:$0xff] }
  0x65   :  { %1744 = vmatprep.subr.bf16.mxu0 %v2957_v29  ;;  %1817 = vmatprep.subr.bf16.mxu1 %v2959_v30  ;;  %v121_v29 = vld [vmem:[#allocation5 + $0x1d8] sm:$0xff]  ;;  %v2833_v33 = vcombine.high %v112_v26, %v120_v27  ;;  %v2832_v40 = vcombine.low %v112_v26, %v120_v27  ;;  %v224_v26 = vld [vmem:[#allocation5 + $0x510] sm:$0xff] }
  0x66   :  { %v3365_v30 = vld [vmem:[#allocation2 + $0x10] ss:$8 sps:$4 sm:$0xff]   ;;  %v2835_v34 = vcombine.high %v113_v28, %v121_v29  ;;  %v2834_v41 = vcombine.low %v113_v28, %v121_v29 }
  0x67   :  { %v201_v12 = vld [vmem:[#allocation5 + $0x458] sm:$0xff]  ;;  %v232_v27 = vld [vmem:[#allocation5 + $0x550] sm:$0xff] }
  0x68   :  { %1745 = vmatpush1.bf16.msra.mxu0 %v2956_v35  ;;  %1818 = vmatpush1.bf16.msra.mxu1 %v2958_v36  ;;  %v128_v35 = vld [vmem:[#allocation5 + $0x210] sm:$0xff]  ;;  %v209_v20 = vld [vmem:[#allocation5 + $0x498] sm:$0xff] }
  0x69   :  { %1746 = vmatprep.subr.bf16.mxu0 %v2973_v37  ;;  %1819 = vmatprep.subr.bf16.mxu1 %v2975_v38  ;;  %v136_v36 = vld [vmem:[#allocation5 + $0x250] sm:$0xff]  ;;  %v3367_v37 = vld [vmem:[#allocation2 + $0x24] ss:$8 sps:$4 sm:$0xff]   ;;  %v129_v38 = vld [vmem:[#allocation5 + $0x218] sm:$0xff] }
  0x6a   :  { %v2849_v42 = vcombine.high %v128_v35, %v136_v36  ;;  %v2848_v49 = vcombine.low %v128_v35, %v136_v36  ;;  %v2850_v50 = vcombine.low %v129_v38, %v137_v39  ;;  %v217_v21 = vld [vmem:[#allocation5 + $0x4d8] sm:$0xff]  ;;  %v240_v35 = vld [vmem:[#allocation5 + $0x590] sm:$0xff] }
  0x6b   :  { %v225_v28 = vld [vmem:[#allocation5 + $0x518] sm:$0xff]  ;;  %v248_v36 = vld [vmem:[#allocation5 + $0x5d0] sm:$0xff] }
  0x6c   :  { %1747 = vmatpush1.bf16.msra.mxu0 %v2972_v43  ;;  %1820 = vmatpush1.bf16.msra.mxu1 %v2974_v44  ;;  %v2851_v43 = vcombine.high %v129_v38, %v137_v39  ;;  %v144_v44 = vld [vmem:[#allocation5 + $0x290] sm:$0xff]  ;;  %v233_v29 = vld [vmem:[#allocation5 + $0x558] sm:$0xff] }
  0x6d   :  { %1748 = vmatprep.subr.bf16.mxu0 %v2989_v45  ;;  %1821 = vmatprep.subr.bf16.mxu1 %v2991_v46  ;;  %v152_v45 = vld [vmem:[#allocation5 + $0x2d0] sm:$0xff]  ;;  %v145_v46 = vld [vmem:[#allocation5 + $0x298] sm:$0xff] }
  0x6e   :  { %v2864_v59 = vcombine.low %v144_v44, %v152_v45  ;;  %v241_v38 = vld [vmem:[#allocation5 + $0x598] sm:$0xff] }
  0x6f   :  { %v249_v39 = vld [vmem:[#allocation5 + $0x5d8] sm:$0xff] }
  0x70   :  { %1749 = vmatpush1.bf16.msra.mxu0 %v2988_v51  ;;  %1822 = vmatpush1.bf16.msra.mxu1 %v2990_v52  ;;  %v2865_v51 = vcombine.high %v144_v44, %v152_v45  ;;  %v2867_v52 = vcombine.high %v145_v46, %v153_v47  ;;  %v256_v44 = vld [vmem:[#allocation5 + $0x610] sm:$0xff] }
  0x71   :  { %1750 = vmatprep.subr.bf16.mxu0 %v3005_v53  ;;  %1823 = vmatprep.subr.bf16.mxu1 %v3007_v54  ;;  %v160_v53 = vld [vmem:[#allocation5 + $0x310] sm:$0xff] }
  0x72   :  { %v168_v54 = vld [vmem:[#allocation5 + $0x350] sm:$0xff] }
  0x73   :  { %v264_v45 = vld [vmem:[#allocation5 + $0x650] sm:$0xff] }
  0x74   :  { %1751 = vmatpush1.bf16.msra.mxu0 %v3004_v60  ;;  %1824 = vmatpush1.bf16.msra.mxu1 %v3006_v61  ;;  %v2866_v60 = vcombine.low %v145_v46, %v153_v47  ;;  %v2881_v61 = vcombine.high %v160_v53, %v168_v54  ;;  %v257_v46 = vld [vmem:[#allocation5 + $0x618] sm:$0xff] }
  0x75   :  { %1752 = vmatprep.subr.bf16.mxu0 %v3021_v62  ;;  %1825 = vmatprep.subr.bf16.mxu1 %v3023_v63  ;;  %v2883_v62 = vcombine.high %v161_v57, %v169_v58  ;;  %v176_v63 = vld [vmem:[#allocation5 + $0x390] sm:$0xff]  ;;  %v265_v47 = vld [vmem:[#allocation5 + $0x658] sm:$0xff] }
  0x78   :  { %1753 = vmatpush1.bf16.msra.mxu0 %v3020_v4  ;;  %1826 = vmatpush1.bf16.msra.mxu1 %v3022_v5  ;;  %v2880_v4 = vcombine.low %v160_v53, %v168_v54  ;;  %v2882_v5 = vcombine.low %v161_v57, %v169_v58  ;;  %v272_v53 = vld [vmem:[#allocation5 + $0x690] sm:$0xff]  ;;  %v273_v57 = vld [vmem:[#allocation5 + $0x698] sm:$0xff] }
  0x79   :  { %1868 = vmatprep.subr.bf16.mxu0 %v2785_v6  ;;  %1941 = vmatprep.subr.bf16.mxu1 %v2787_v7  ;;  %v2897_v6 = vcombine.high %v176_v63, %v184_v0  ;;  %v2899_v7 = vcombine.high %v177_v1, %v185_v2  ;;  %v280_v54 = vld [vmem:[#allocation5 + $0x6d0] sm:$0xff]  ;;  %v281_v58 = vld [vmem:[#allocation5 + $0x6d8] sm:$0xff] }
  0x7b   :  { %1755 = vmatmul.mubr.bf16.vlgmr.msra.gmra.mrb[0].mxu0 %v3357_v10  ;;  %1828 = vmatmul.mubr.bf16.vlgmr.msra.gmra.mrb[0].mxu1 %v3357_v10 }
  0x7c   :  { %1869 = vmatpush1.bf16.msra.mxu0 %v2784_v13  ;;  %1942 = vmatpush1.bf16.msra.mxu1 %v2786_v14  ;;  %v2896_v13 = vcombine.low %v176_v63, %v184_v0  ;;  %v2898_v14 = vcombine.low %v177_v1, %v185_v2  ;;  %v288_v63 = vld [vmem:[#allocation5 + $0x710] sm:$0xff]  ;;  %v289_v1 = vld [vmem:[#allocation5 + $0x718] sm:$0xff] }
  0x7d   :  { %1870 = vmatprep.subr.bf16.mxu0 %v2801_v15  ;;  %1943 = vmatprep.subr.bf16.mxu1 %v2803_v16  ;;  %v2913_v15 = vcombine.high %v192_v8, %v200_v9  ;;  %v2915_v16 = vcombine.high %v193_v11, %v201_v12  ;;  %v296_v0 = vld [vmem:[#allocation5 + $0x750] sm:$0xff]  ;;  %v297_v2 = vld [vmem:[#allocation5 + $0x758] sm:$0xff] }
  0x7e   :  { %1764 = vmatprep.mubr.bf16.mxu0 %v3359_v19  ;;  %1837 = vmatprep.mubr.bf16.mxu1 %v3359_v19 }
  0x80   :  { %1871 = vmatpush1.bf16.msra.mxu0 %v2800_v22  ;;  %1944 = vmatpush1.bf16.msra.mxu1 %v2802_v23  ;;  %v2912_v22 = vcombine.low %v192_v8, %v200_v9  ;;  %v2914_v23 = vcombine.low %v193_v11, %v201_v12  ;;  %v304_v8 = vld [vmem:[#allocation5 + $0x790] sm:$0xff]  ;;  %v305_v11 = vld [vmem:[#allocation5 + $0x798] sm:$0xff] }
  0x81   :  { %1872 = vmatprep.subr.bf16.mxu0 %v2817_v24  ;;  %1945 = vmatprep.subr.bf16.mxu1 %v2819_v25  ;;  %v2929_v24 = vcombine.high %v208_v17, %v216_v18  ;;  %v2931_v25 = vcombine.high %v209_v20, %v217_v21  ;;  %v312_v9 = vld [vmem:[#allocation5 + $0x7d0] sm:$0xff]  ;;  %v313_v12 = vld [vmem:[#allocation5 + $0x7d8] sm:$0xff] }
  0x83   :  { %1765 = vmatmul.mubr.bf16.gmra.mrb[4].mxu0 %v3365_v30  ;;  %1838 = vmatmul.mubr.bf16.gmra.mrb[4].mxu1 %v3365_v30 }
  0x84   :  { %1873 = vmatpush1.bf16.msra.mxu0 %v2816_v31  ;;  %1946 = vmatpush1.bf16.msra.mxu1 %v2818_v32  ;;  %v2928_v31 = vcombine.low %v208_v17, %v216_v18  ;;  %v2930_v32 = vcombine.low %v209_v20, %v217_v21  ;;  %v66_v17 = vld [vmem:[#allocation5 + $0x20] sm:$0xff]  ;;  %v67_v20 = vld [vmem:[#allocation5 + $0x28] sm:$0xff] }
  0x85   :  { %1874 = vmatprep.subr.bf16.mxu0 %v2833_v33  ;;  %1947 = vmatprep.subr.bf16.mxu1 %v2835_v34  ;;  %v2945_v33 = vcombine.high %v224_v26, %v232_v27  ;;  %v2947_v34 = vcombine.high %v225_v28, %v233_v29  ;;  %v74_v18 = vld [vmem:[#allocation5 + $0x60] sm:$0xff]  ;;  %v75_v21 = vld [vmem:[#allocation5 + $0x68] sm:$0xff] }
  0x86   :  { %1774 = vmatprep.mubr.bf16.mxu0 %v3367_v37  ;;  %1847 = vmatprep.mubr.bf16.mxu1 %v3367_v37 }
  0x88   :  { %1875 = vmatpush1.bf16.msra.mxu0 %v2832_v40  ;;  %1948 = vmatpush1.bf16.msra.mxu1 %v2834_v41  ;;  %v2944_v40 = vcombine.low %v224_v26, %v232_v27  ;;  %v2946_v41 = vcombine.low %v225_v28, %v233_v29  ;;  %v82_v26 = vld [vmem:[#allocation5 + $0xa0] sm:$0xff]  ;;  %v83_v28 = vld [vmem:[#allocation5 + $0xa8] sm:$0xff] }
  0x89   :  { %1876 = vmatprep.subr.bf16.mxu0 %v2849_v42  ;;  %1949 = vmatprep.subr.bf16.mxu1 %v2851_v43  ;;  %v2961_v42 = vcombine.high %v240_v35, %v248_v36  ;;  %v2963_v43 = vcombine.high %v241_v38, %v249_v39  ;;  %v90_v27 = vld [vmem:[#allocation5 + $0xe0] sm:$0xff]  ;;  %v91_v29 = vld [vmem:[#allocation5 + $0xe8] sm:$0xff] }
  0x8b   :  { %1775 = vmatmul.mubr.bf16.gmra.mrb[8].mxu0 %v3373_v48  ;;  %1848 = vmatmul.mubr.bf16.gmra.mrb[8].mxu1 %v3373_v48 }
  0x8c   :  { %1877 = vmatpush1.bf16.msra.mxu0 %v2848_v49  ;;  %1950 = vmatpush1.bf16.msra.mxu1 %v2850_v50  ;;  %v2960_v49 = vcombine.low %v240_v35, %v248_v36  ;;  %v2962_v50 = vcombine.low %v241_v38, %v249_v39  ;;  %v98_v35 = vld [vmem:[#allocation5 + $0x120] sm:$0xff]  ;;  %v99_v38 = vld [vmem:[#allocation5 + $0x128] sm:$0xff] }
  0x8d   :  { %1878 = vmatprep.subr.bf16.mxu0 %v2865_v51  ;;  %1951 = vmatprep.subr.bf16.mxu1 %v2867_v52  ;;  %v2977_v51 = vcombine.high %v256_v44, %v264_v45  ;;  %v2979_v52 = vcombine.high %v257_v46, %v265_v47  ;;  %v106_v36 = vld [vmem:[#allocation5 + $0x160] sm:$0xff]  ;;  %v107_v39 = vld [vmem:[#allocation5 + $0x168] sm:$0xff] }
  0x8e   :  { %1784 = vmatprep.mubr.bf16.mxu0 %v3375_v55  ;;  %1857 = vmatprep.mubr.bf16.mxu1 %v3375_v55 }
  0x90   :  { %1879 = vmatpush1.bf16.msra.mxu0 %v2864_v59  ;;  %1952 = vmatpush1.bf16.msra.mxu1 %v2866_v60  ;;  %v2976_v59 = vcombine.low %v256_v44, %v264_v45  ;;  %v2978_v60 = vcombine.low %v257_v46, %v265_v47  ;;  %v114_v44 = vld [vmem:[#allocation5 + $0x1a0] sm:$0xff]  ;;  %v115_v46 = vld [vmem:[#allocation5 + $0x1a8] sm:$0xff] }
  0x91   :  { %1880 = vmatprep.subr.bf16.mxu0 %v2881_v61  ;;  %1953 = vmatprep.subr.bf16.mxu1 %v2883_v62  ;;  %v2993_v61 = vcombine.high %v272_v53, %v280_v54  ;;  %v2995_v62 = vcombine.high %v273_v57, %v281_v58  ;;  %v122_v45 = vld [vmem:[#allocation5 + $0x1e0] sm:$0xff]  ;;  %v123_v47 = vld [vmem:[#allocation5 + $0x1e8] sm:$0xff] }
  0x93   :  { %1785 = vmatmul.mubr.bf16.gmra.mrb[12].mxu0 %v3381_v3  ;;  %1858 = vmatmul.mubr.bf16.gmra.mrb[12].mxu1 %v3381_v3 }
  0x94   :  { %1881 = vmatpush1.bf16.msra.mxu0 %v2880_v4  ;;  %1954 = vmatpush1.bf16.msra.mxu1 %v2882_v5  ;;  %v2992_v4 = vcombine.low %v272_v53, %v280_v54  ;;  %v2994_v5 = vcombine.low %v273_v57, %v281_v58  ;;  %v130_v53 = vld [vmem:[#allocation5 + $0x220] sm:$0xff]  ;;  %v131_v57 = vld [vmem:[#allocation5 + $0x228] sm:$0xff] }
  0x95   :  { %1882 = vmatprep.subr.bf16.mxu0 %v2897_v6  ;;  %1955 = vmatprep.subr.bf16.mxu1 %v2899_v7  ;;  %v3009_v6 = vcombine.high %v288_v63, %v296_v0  ;;  %v3011_v7 = vcombine.high %v289_v1, %v297_v2  ;;  %v138_v54 = vld [vmem:[#allocation5 + $0x260] sm:$0xff]  ;;  %v139_v58 = vld [vmem:[#allocation5 + $0x268] sm:$0xff] }
  0x96   :  { %1900 = vmatprep.mubr.bf16.mxu0 %v3353_v56  ;;  %1973 = vmatprep.mubr.bf16.mxu1 %v3353_v56 }
  0x98   :  { %1883 = vmatpush1.bf16.msra.mxu0 %v2896_v13  ;;  %1956 = vmatpush1.bf16.msra.mxu1 %v2898_v14  ;;  %v3008_v13 = vcombine.low %v288_v63, %v296_v0  ;;  %v3010_v14 = vcombine.low %v289_v1, %v297_v2  ;;  %v146_v63 = vld [vmem:[#allocation5 + $0x2a0] sm:$0xff]  ;;  %v147_v1 = vld [vmem:[#allocation5 + $0x2a8] sm:$0xff] }
  0x99   :  { %1884 = vmatprep.subr.bf16.mxu0 %v2913_v15  ;;  %1957 = vmatprep.subr.bf16.mxu1 %v2915_v16  ;;  %v3025_v15 = vcombine.high %v304_v8, %v312_v9  ;;  %v3027_v16 = vcombine.high %v305_v11, %v313_v12  ;;  %v154_v0 = vld [vmem:[#allocation5 + $0x2e0] sm:$0xff]  ;;  %v155_v2 = vld [vmem:[#allocation5 + $0x2e8] sm:$0xff] }
  0x9c   :  { %1885 = vmatpush1.bf16.msra.mxu0 %v2912_v22  ;;  %1958 = vmatpush1.bf16.msra.mxu1 %v2914_v23  ;;  %v3024_v22 = vcombine.low %v304_v8, %v312_v9  ;;  %v3026_v23 = vcombine.low %v305_v11, %v313_v12  ;;  %v162_v8 = vld [vmem:[#allocation5 + $0x320] sm:$0xff]  ;;  %v163_v11 = vld [vmem:[#allocation5 + $0x328] sm:$0xff] }
  0x9d   :  { %1886 = vmatprep.subr.bf16.mxu0 %v2929_v24  ;;  %1959 = vmatprep.subr.bf16.mxu1 %v2931_v25  ;;  %v2789_v24 = vcombine.high %v66_v17, %v74_v18  ;;  %v2791_v25 = vcombine.high %v67_v20, %v75_v21  ;;  %v170_v9 = vld [vmem:[#allocation5 + $0x360] sm:$0xff]  ;;  %v171_v12 = vld [vmem:[#allocation5 + $0x368] sm:$0xff] }
  0xa0   :  { %1887 = vmatpush1.bf16.msra.mxu0 %v2928_v31  ;;  %1960 = vmatpush1.bf16.msra.mxu1 %v2930_v32  ;;  %v2788_v31 = vcombine.low %v66_v17, %v74_v18  ;;  %v2790_v32 = vcombine.low %v67_v20, %v75_v21  ;;  %v178_v17 = vld [vmem:[#allocation5 + $0x3a0] sm:$0xff]  ;;  %v179_v20 = vld [vmem:[#allocation5 + $0x3a8] sm:$0xff] }
  0xa1   :  { %1888 = vmatprep.subr.bf16.mxu0 %v2945_v33  ;;  %1961 = vmatprep.subr.bf16.mxu1 %v2947_v34  ;;  %v2805_v33 = vcombine.high %v82_v26, %v90_v27  ;;  %v2807_v34 = vcombine.high %v83_v28, %v91_v29  ;;  %v186_v18 = vld [vmem:[#allocation5 + $0x3e0] sm:$0xff]  ;;  %v187_v21 = vld [vmem:[#allocation5 + $0x3e8] sm:$0xff] }
  0xa4   :  { %1889 = vmatpush1.bf16.msra.mxu0 %v2944_v40  ;;  %1962 = vmatpush1.bf16.msra.mxu1 %v2946_v41  ;;  %v2804_v40 = vcombine.low %v82_v26, %v90_v27  ;;  %v2806_v41 = vcombine.low %v83_v28, %v91_v29  ;;  %v194_v26 = vld [vmem:[#allocation5 + $0x420] sm:$0xff]  ;;  %v195_v28 = vld [vmem:[#allocation5 + $0x428] sm:$0xff] }
  0xa5   :  { %1890 = vmatprep.subr.bf16.mxu0 %v2961_v42  ;;  %1963 = vmatprep.subr.bf16.mxu1 %v2963_v43  ;;  %v2821_v42 = vcombine.high %v98_v35, %v106_v36  ;;  %v2823_v43 = vcombine.high %v99_v38, %v107_v39  ;;  %v202_v27 = vld [vmem:[#allocation5 + $0x460] sm:$0xff]  ;;  %v203_v29 = vld [vmem:[#allocation5 + $0x468] sm:$0xff] }
  0xa8   :  { %1891 = vmatpush1.bf16.msra.mxu0 %v2960_v49  ;;  %1964 = vmatpush1.bf16.msra.mxu1 %v2962_v50  ;;  %v2820_v49 = vcombine.low %v98_v35, %v106_v36  ;;  %v2822_v50 = vcombine.low %v99_v38, %v107_v39  ;;  %v210_v35 = vld [vmem:[#allocation5 + $0x4a0] sm:$0xff]  ;;  %v211_v38 = vld [vmem:[#allocation5 + $0x4a8] sm:$0xff] }
  0xa9   :  { %1892 = vmatprep.subr.bf16.mxu0 %v2977_v51  ;;  %1965 = vmatprep.subr.bf16.mxu1 %v2979_v52  ;;  %v2837_v51 = vcombine.high %v114_v44, %v122_v45  ;;  %v2839_v52 = vcombine.high %v115_v46, %v123_v47  ;;  %v218_v36 = vld [vmem:[#allocation5 + $0x4e0] sm:$0xff]  ;;  %v219_v39 = vld [vmem:[#allocation5 + $0x4e8] sm:$0xff] }
  0xac   :  { %1893 = vmatpush1.bf16.msra.mxu0 %v2976_v59  ;;  %1966 = vmatpush1.bf16.msra.mxu1 %v2978_v60  ;;  %v2836_v59 = vcombine.low %v114_v44, %v122_v45  ;;  %v2838_v60 = vcombine.low %v115_v46, %v123_v47  ;;  %v226_v44 = vld [vmem:[#allocation5 + $0x520] sm:$0xff]  ;;  %v227_v46 = vld [vmem:[#allocation5 + $0x528] sm:$0xff] }
  0xad   :  { %1894 = vmatprep.subr.bf16.mxu0 %v2993_v61  ;;  %1967 = vmatprep.subr.bf16.mxu1 %v2995_v62  ;;  %v2853_v61 = vcombine.high %v130_v53, %v138_v54  ;;  %v2855_v62 = vcombine.high %v131_v57, %v139_v58  ;;  %v234_v45 = vld [vmem:[#allocation5 + $0x560] sm:$0xff]  ;;  %v235_v47 = vld [vmem:[#allocation5 + $0x568] sm:$0xff] }
  0xb0   :  { %1895 = vmatpush1.bf16.msra.mxu0 %v2992_v4  ;;  %1968 = vmatpush1.bf16.msra.mxu1 %v2994_v5  ;;  %v2852_v4 = vcombine.low %v130_v53, %v138_v54  ;;  %v2854_v5 = vcombine.low %v131_v57, %v139_v58  ;;  %v250_v53 = vld [vmem:[#allocation5 + $0x5e0] sm:$0xff]  ;;  %v243_v54 = vld [vmem:[#allocation5 + $0x5a8] sm:$0xff]  ;;  %v2948_v58 = vcombine.low %v226_v44, %v234_v45 }
  0xb1   :  { %1896 = vmatprep.subr.bf16.mxu0 %v3009_v6  ;;  %1969 = vmatprep.subr.bf16.mxu1 %v3011_v7  ;;  %v2869_v6 = vcombine.high %v146_v63, %v154_v0  ;;  %v2871_v7 = vcombine.high %v147_v1, %v155_v2  ;;  %v251_v57 = vld [vmem:[#allocation5 + $0x5e8] sm:$0xff] }
  0xb4   :  { %1897 = vmatpush1.bf16.msra.mxu0 %v3008_v13  ;;  %1970 = vmatpush1.bf16.msra.mxu1 %v3010_v14  ;;  %v2868_v13 = vcombine.low %v146_v63, %v154_v0  ;;  %v2870_v14 = vcombine.low %v147_v1, %v155_v2  ;;  %v266_v63 = vld [vmem:[#allocation5 + $0x660] sm:$0xff]  ;;  %v259_v0 = vld [vmem:[#allocation5 + $0x628] sm:$0xff] }
  0xb5   :  { %1898 = vmatprep.subr.bf16.mxu0 %v3025_v15  ;;  %1971 = vmatprep.subr.bf16.mxu1 %v3027_v16  ;;  %v2885_v15 = vcombine.high %v162_v8, %v170_v9  ;;  %v2887_v16 = vcombine.high %v163_v11, %v171_v12  ;;  %v267_v1 = vld [vmem:[#allocation5 + $0x668] sm:$0xff] }
  0xb8   :  { %1899 = vmatpush1.bf16.msra.mxu0 %v3024_v22  ;;  %1972 = vmatpush1.bf16.msra.mxu1 %v3026_v23  ;;  %v2884_v22 = vcombine.low %v162_v8, %v170_v9  ;;  %v2886_v23 = vcombine.low %v163_v11, %v171_v12  ;;  %v282_v8 = vld [vmem:[#allocation5 + $0x6e0] sm:$0xff]  ;;  %v275_v9 = vld [vmem:[#allocation5 + $0x6a8] sm:$0xff] }
  0xb9   :  { %2014 = vmatprep.subr.bf16.mxu0 %v2789_v24  ;;  %2087 = vmatprep.subr.bf16.mxu1 %v2791_v25  ;;  %v2901_v24 = vcombine.high %v178_v17, %v186_v18  ;;  %v2903_v25 = vcombine.high %v179_v20, %v187_v21  ;;  %v283_v11 = vld [vmem:[#allocation5 + $0x6e8] sm:$0xff] }
  0xbb   :  { %1901 = vmatmul.mubr.bf16.vlgmr.msra.gmra.mrb[16].mxu0 %v3357_v10  ;;  %1974 = vmatmul.mubr.bf16.vlgmr.msra.gmra.mrb[16].mxu1 %v3357_v10 }
  0xbc   :  { %2015 = vmatpush1.bf16.msra.mxu0 %v2788_v31  ;;  %2088 = vmatpush1.bf16.msra.mxu1 %v2790_v32  ;;  %v2900_v31 = vcombine.low %v178_v17, %v186_v18  ;;  %v2902_v32 = vcombine.low %v179_v20, %v187_v21  ;;  %v298_v17 = vld [vmem:[#allocation5 + $0x760] sm:$0xff]  ;;  %v291_v18 = vld [vmem:[#allocation5 + $0x728] sm:$0xff] }
  0xbd   :  { %2016 = vmatprep.subr.bf16.mxu0 %v2805_v33  ;;  %2089 = vmatprep.subr.bf16.mxu1 %v2807_v34  ;;  %v2917_v33 = vcombine.high %v194_v26, %v202_v27  ;;  %v2919_v34 = vcombine.high %v195_v28, %v203_v29  ;;  %v299_v20 = vld [vmem:[#allocation5 + $0x768] sm:$0xff] }
  0xbe   :  { %1910 = vmatprep.mubr.bf16.mxu0 %v3359_v19  ;;  %1983 = vmatprep.mubr.bf16.mxu1 %v3359_v19 }
  0xc0   :  { %2017 = vmatpush1.bf16.msra.mxu0 %v2804_v40  ;;  %2090 = vmatpush1.bf16.msra.mxu1 %v2806_v41  ;;  %v2916_v40 = vcombine.low %v194_v26, %v202_v27  ;;  %v2918_v41 = vcombine.low %v195_v28, %v203_v29  ;;  %v314_v26 = vld [vmem:[#allocation5 + $0x7e0] sm:$0xff]  ;;  %v307_v27 = vld [vmem:[#allocation5 + $0x7a8] sm:$0xff] }
  0xc1   :  { %2018 = vmatprep.subr.bf16.mxu0 %v2821_v42  ;;  %2091 = vmatprep.subr.bf16.mxu1 %v2823_v43  ;;  %v2933_v42 = vcombine.high %v210_v35, %v218_v36  ;;  %v2935_v43 = vcombine.high %v211_v38, %v219_v39  ;;  %v315_v28 = vld [vmem:[#allocation5 + $0x7e8] sm:$0xff] }
  0xc3   :  { %1911 = vmatmul.mubr.bf16.gmra.mrb[20].mxu0 %v3365_v30  ;;  %1984 = vmatmul.mubr.bf16.gmra.mrb[20].mxu1 %v3365_v30 }
  0xc4   :  { %2019 = vmatpush1.bf16.msra.mxu0 %v2820_v49  ;;  %2092 = vmatpush1.bf16.msra.mxu1 %v2822_v50  ;;  %v2932_v49 = vcombine.low %v210_v35, %v218_v36  ;;  %v2934_v50 = vcombine.low %v211_v38, %v219_v39  ;;  %v76_v35 = vld [vmem:[#allocation5 + $0x70] sm:$0xff]  ;;  %v69_v36 = vld [vmem:[#allocation5 + $0x38] sm:$0xff] }
  0xc5   :  { %2020 = vmatprep.subr.bf16.mxu0 %v2837_v51  ;;  %2093 = vmatprep.subr.bf16.mxu1 %v2839_v52  ;;  %v2949_v51 = vcombine.high %v226_v44, %v234_v45  ;;  %v242_v52 = vld [vmem:[#allocation5 + $0x5a0] sm:$0xff]  ;;  %v77_v38 = vld [vmem:[#allocation5 + $0x78] sm:$0xff]  ;;  %v92_v44 = vld [vmem:[#allocation5 + $0xf0] sm:$0xff] }
  0xc6   :  { %1920 = vmatprep.mubr.bf16.mxu0 %v3367_v37  ;;  %1993 = vmatprep.mubr.bf16.mxu1 %v3367_v37  ;;  %v2964_v2 = vcombine.low %v242_v52, %v250_v53  ;;  %v85_v45 = vld [vmem:[#allocation5 + $0xb8] sm:$0xff] }
  0xc8   :  { %2021 = vmatpush1.bf16.msra.mxu0 %v2836_v59  ;;  %2094 = vmatpush1.bf16.msra.mxu1 %v2838_v60  ;;  %v2950_v59 = vcombine.low %v227_v46, %v235_v47  ;;  %v2965_v60 = vcombine.high %v242_v52, %v250_v53  ;;  %v108_v52 = vld [vmem:[#allocation5 + $0x170] sm:$0xff]  ;;  %v101_v53 = vld [vmem:[#allocation5 + $0x138] sm:$0xff] }
  0xc9   :  { %2022 = vmatprep.subr.bf16.mxu0 %v2853_v61  ;;  %2095 = vmatprep.subr.bf16.mxu1 %v2855_v62  ;;  %v2967_v61 = vcombine.high %v243_v54, %v251_v57  ;;  %v258_v62 = vld [vmem:[#allocation5 + $0x620] sm:$0xff] }
  0xca   :  { %v2980_v12 = vcombine.low %v258_v62, %v266_v63 }
  0xcb   :  { %1921 = vmatmul.mubr.bf16.gmra.mrb[24].mxu0 %v3373_v48  ;;  %1994 = vmatmul.mubr.bf16.gmra.mrb[24].mxu1 %v3373_v48 }
  0xcc   :  { %2023 = vmatpush1.bf16.msra.mxu0 %v2852_v4  ;;  %2096 = vmatpush1.bf16.msra.mxu1 %v2854_v5  ;;  %v2966_v4 = vcombine.low %v243_v54, %v251_v57  ;;  %v2981_v5 = vcombine.high %v258_v62, %v266_v63  ;;  %v109_v54 = vld [vmem:[#allocation5 + $0x178] sm:$0xff]  ;;  %v124_v62 = vld [vmem:[#allocation5 + $0x1f0] sm:$0xff] }
  0xcd   :  { %2024 = vmatprep.subr.bf16.mxu0 %v2869_v6  ;;  %2097 = vmatprep.subr.bf16.mxu1 %v2871_v7  ;;  %v2983_v6 = vcombine.high %v259_v0, %v267_v1  ;;  %v274_v7 = vld [vmem:[#allocation5 + $0x6a0] sm:$0xff]  ;;  %v117_v63 = vld [vmem:[#allocation5 + $0x1b8] sm:$0xff] }
  0xce   :  { %1930 = vmatprep.mubr.bf16.mxu0 %v3375_v55  ;;  %2003 = vmatprep.mubr.bf16.mxu1 %v3375_v55  ;;  %v2996_v21 = vcombine.low %v274_v7, %v282_v8 }
  0xd0   :  { %2025 = vmatpush1.bf16.msra.mxu0 %v2868_v13  ;;  %2098 = vmatpush1.bf16.msra.mxu1 %v2870_v14  ;;  %v2982_v13 = vcombine.low %v259_v0, %v267_v1  ;;  %v2997_v14 = vcombine.high %v274_v7, %v282_v8  ;;  %v125_v0 = vld [vmem:[#allocation5 + $0x1f8] sm:$0xff] }
  0xd1   :  { %2026 = vmatprep.subr.bf16.mxu0 %v2885_v15  ;;  %2099 = vmatprep.subr.bf16.mxu1 %v2887_v16  ;;  %v2999_v15 = vcombine.high %v275_v9, %v283_v11  ;;  %v290_v16 = vld [vmem:[#allocation5 + $0x720] sm:$0xff]  ;;  %v133_v7 = vld [vmem:[#allocation5 + $0x238] sm:$0xff] }
  0xd2   :  { %v3012_v29 = vcombine.low %v290_v16, %v298_v17  ;;  %v141_v8 = vld [vmem:[#allocation5 + $0x278] sm:$0xff] }
  0xd3   :  { %1931 = vmatmul.mubr.bf16.gmra.mrb[28].mxu0 %v3381_v3  ;;  %2004 = vmatmul.mubr.bf16.gmra.mrb[28].mxu1 %v3381_v3 }
  0xd4   :  { %2027 = vmatpush1.bf16.msra.mxu0 %v2884_v22  ;;  %2100 = vmatpush1.bf16.msra.mxu1 %v2886_v23  ;;  %v2998_v22 = vcombine.low %v275_v9, %v283_v11  ;;  %v3013_v23 = vcombine.high %v290_v16, %v298_v17  ;;  %v157_v16 = vld [vmem:[#allocation5 + $0x2f8] sm:$0xff] }
  0xd5   :  { %2028 = vmatprep.subr.bf16.mxu0 %v2901_v24  ;;  %2101 = vmatprep.subr.bf16.mxu1 %v2903_v25  ;;  %v3015_v24 = vcombine.high %v291_v18, %v299_v20  ;;  %v306_v25 = vld [vmem:[#allocation5 + $0x7a0] sm:$0xff] }
  0xd6   :  { %2046 = vmatprep.mubr.bf16.mxu0 %v3353_v56  ;;  %2119 = vmatprep.mubr.bf16.mxu1 %v3353_v56  ;;  %v2951_v56 = vcombine.high %v227_v46, %v235_v47  ;;  %v3028_v39 = vcombine.low %v306_v25, %v314_v26  ;;  %v93_v46 = vld [vmem:[#allocation5 + $0xf8] sm:$0xff] }
  0xd8   :  { %2029 = vmatpush1.bf16.msra.mxu0 %v2900_v31  ;;  %2102 = vmatpush1.bf16.msra.mxu1 %v2902_v32  ;;  %v3014_v31 = vcombine.low %v291_v18, %v299_v20  ;;  %v3029_v32 = vcombine.high %v306_v25, %v314_v26  ;;  %v2858_v18 = vcombine.low %v133_v7, %v141_v8 }
  0xd9   :  { %2030 = vmatprep.subr.bf16.mxu0 %v2917_v33  ;;  %2103 = vmatprep.subr.bf16.mxu1 %v2919_v34  ;;  %v3031_v33 = vcombine.high %v307_v27, %v315_v28  ;;  %v68_v34 = vld [vmem:[#allocation5 + $0x30] sm:$0xff] }
  0xda   :  { %v2792_v47 = vcombine.low %v68_v34, %v76_v35 }
  0xdc   :  { %2031 = vmatpush1.bf16.msra.mxu0 %v2916_v40  ;;  %2104 = vmatpush1.bf16.msra.mxu1 %v2918_v41  ;;  %v3030_v40 = vcombine.low %v307_v27, %v315_v28  ;;  %v2793_v41 = vcombine.high %v68_v34, %v76_v35  ;;  %v180_v28 = vld [vmem:[#allocation5 + $0x3b0] sm:$0xff] }
  0xdd   :  { %2032 = vmatprep.subr.bf16.mxu0 %v2933_v42  ;;  %2105 = vmatprep.subr.bf16.mxu1 %v2935_v43  ;;  %v2795_v42 = vcombine.high %v69_v36, %v77_v38  ;;  %v84_v43 = vld [vmem:[#allocation5 + $0xb0] sm:$0xff] }
  0xde   :  { %v2808_v57 = vcombine.low %v84_v43, %v92_v44 }
  0xe0   :  { %2033 = vmatpush1.bf16.msra.mxu0 %v2932_v49  ;;  %2106 = vmatpush1.bf16.msra.mxu1 %v2934_v50  ;;  %v2794_v49 = vcombine.low %v69_v36, %v77_v38  ;;  %v2809_v50 = vcombine.high %v84_v43, %v92_v44  ;;  %v196_v36 = vld [vmem:[#allocation5 + $0x430] sm:$0xff] }
  0xe1   :  { %2034 = vmatprep.subr.bf16.mxu0 %v2949_v51  ;;  %2107 = vmatprep.subr.bf16.mxu1 %v2951_v56  ;;  %v2811_v51 = vcombine.high %v85_v45, %v93_v46  ;;  %v100_v56 = vld [vmem:[#allocation5 + $0x130] sm:$0xff] }
  0xe2   :  { %v2824_v1 = vcombine.low %v100_v56, %v108_v52  ;;  %v204_v38 = vld [vmem:[#allocation5 + $0x470] sm:$0xff] }
  0xe3   :  { %v212_v44 = vld [vmem:[#allocation5 + $0x4b0] sm:$0xff] }
  0xe4   :  { %2035 = vmatpush1.bf16.msra.mxu0 %v2948_v58  ;;  %2108 = vmatpush1.bf16.msra.mxu1 %v2950_v59  ;;  %v2810_v58 = vcombine.low %v85_v45, %v93_v46  ;;  %v2825_v59 = vcombine.high %v100_v56, %v108_v52  ;;  %v220_v45 = vld [vmem:[#allocation5 + $0x4f0] sm:$0xff]  ;;  %v3184_v46 = vld [vmem:[#allocation2 + $0x4] ss:$8 sps:$4 sm:$0xff]  }
  0xe5   :  { %2036 = vmatprep.subr.bf16.mxu0 %v2965_v60  ;;  %2109 = vmatprep.subr.bf16.mxu1 %v2967_v61  ;;  %v2827_v60 = vcombine.high %v101_v53, %v109_v54  ;;  %v116_v61 = vld [vmem:[#allocation5 + $0x1b0] sm:$0xff]  ;;  %v2937_v56 = vcombine.high %v212_v44, %v220_v45 }
  0xe6   :  { %v2840_v9 = vcombine.low %v116_v61, %v124_v62  ;;  %v228_v52 = vld [vmem:[#allocation5 + $0x530] sm:$0xff] }
  0xe8   :  { %2037 = vmatpush1.bf16.msra.mxu0 %v2964_v2  ;;  %2110 = vmatpush1.bf16.msra.mxu1 %v2966_v4  ;;  %v2841_v2 = vcombine.high %v116_v61, %v124_v62  ;;  %v2843_v4 = vcombine.high %v117_v63, %v125_v0  ;;  %v244_v62 = vld [vmem:[#allocation5 + $0x5b0] sm:$0xff] }
  0xe9   :  { %2038 = vmatprep.subr.bf16.mxu0 %v2981_v5  ;;  %2111 = vmatprep.subr.bf16.mxu1 %v2983_v6  ;;  %v132_v5 = vld [vmem:[#allocation5 + $0x230] sm:$0xff] }
  0xea   :  { %v140_v6 = vld [vmem:[#allocation5 + $0x270] sm:$0xff] }
  0xeb   :  { %v2857_v11 = vcombine.high %v132_v5, %v140_v6  ;;  %v2856_v17 = vcombine.low %v132_v5, %v140_v6  ;;  %v260_v6 = vld [vmem:[#allocation5 + $0x630] sm:$0xff] }
  0xec   :  { %2039 = vmatpush1.bf16.msra.mxu0 %v2980_v12  ;;  %2112 = vmatpush1.bf16.msra.mxu1 %v2982_v13  ;;  %v2859_v12 = vcombine.high %v133_v7, %v141_v8  ;;  %v148_v13 = vld [vmem:[#allocation5 + $0x2b0] sm:$0xff]  ;;  %v261_v8 = vld [vmem:[#allocation5 + $0x638] sm:$0xff] }
  0xed   :  { %2040 = vmatprep.subr.bf16.mxu0 %v2997_v14  ;;  %2113 = vmatprep.subr.bf16.mxu1 %v2999_v15  ;;  %v156_v14 = vld [vmem:[#allocation5 + $0x2f0] sm:$0xff]  ;;  %v149_v15 = vld [vmem:[#allocation5 + $0x2b8] sm:$0xff] }
  0xee   :  { %v2875_v20 = vcombine.high %v149_v15, %v157_v16  ;;  %v2872_v25 = vcombine.low %v148_v13, %v156_v14  ;;  %v268_v7 = vld [vmem:[#allocation5 + $0x670] sm:$0xff] }
  0xf0   :  { %2041 = vmatpush1.bf16.msra.mxu0 %v2996_v21  ;;  %2114 = vmatpush1.bf16.msra.mxu1 %v2998_v22  ;;  %v164_v21 = vld [vmem:[#allocation5 + $0x330] sm:$0xff] }
  0xf1   :  { %2042 = vmatprep.subr.bf16.mxu0 %v3013_v23  ;;  %2115 = vmatprep.subr.bf16.mxu1 %v3015_v24  ;;  %v172_v22 = vld [vmem:[#allocation5 + $0x370] sm:$0xff]  ;;  %v165_v23 = vld [vmem:[#allocation5 + $0x338] sm:$0xff] }
  0xf2   :  { %v173_v24 = vld [vmem:[#allocation5 + $0x378] sm:$0xff]  ;;  %v2889_v26 = vcombine.high %v164_v21, %v172_v22 }
  0xf3   :  { %v2891_v27 = vcombine.high %v165_v23, %v173_v24  ;;  %v2890_v34 = vcombine.low %v165_v23, %v173_v24  ;;  %v300_v23 = vld [vmem:[#allocation5 + $0x770] sm:$0xff]  ;;  %v293_v24 = vld [vmem:[#allocation5 + $0x738] sm:$0xff] }
  0xf4   :  { %2043 = vmatpush1.bf16.msra.mxu0 %v3012_v29  ;;  %2116 = vmatpush1.bf16.msra.mxu1 %v3014_v31  ;;  %v188_v29 = vld [vmem:[#allocation5 + $0x3f0] sm:$0xff]  ;;  %v181_v31 = vld [vmem:[#allocation5 + $0x3b8] sm:$0xff] }
  0xf5   :  { %2044 = vmatprep.subr.bf16.mxu0 %v3029_v32  ;;  %2117 = vmatprep.subr.bf16.mxu1 %v3031_v33  ;;  %v189_v32 = vld [vmem:[#allocation5 + $0x3f8] sm:$0xff]  ;;  %v2888_v33 = vcombine.low %v164_v21, %v172_v22  ;;  %v292_v22 = vld [vmem:[#allocation5 + $0x730] sm:$0xff] }
  0xf6   :  { %v2907_v35 = vcombine.high %v181_v31, %v189_v32 }
  0xf8   :  { %2045 = vmatpush1.bf16.msra.mxu0 %v3028_v39  ;;  %2118 = vmatpush1.bf16.msra.mxu1 %v3030_v40  ;;  %v197_v39 = vld [vmem:[#allocation5 + $0x438] sm:$0xff] }
  0xf9   :  { %2160 = vmatprep.subr.bf16.mxu0 %v2793_v41  ;;  %2233 = vmatprep.subr.bf16.mxu1 %v2795_v42  ;;  %v205_v40 = vld [vmem:[#allocation5 + $0x478] sm:$0xff]  ;;  %v2904_v41 = vcombine.low %v180_v28, %v188_v29  ;;  %v2921_v42 = vcombine.high %v196_v36, %v204_v38 }
  0xfa   :  { %v2923_v43 = vcombine.high %v197_v39, %v205_v40 }
  0xfb   :  { %2047 = vmatmul.mubr.bf16.vlgmr.msra.gmra.mrb[32].mxu0 %v3357_v10  ;;  %2120 = vmatmul.mubr.bf16.vlgmr.msra.gmra.mrb[32].mxu1 %v3357_v10  ;;  %v2826_v10 = vcombine.low %v101_v53, %v109_v54  ;;  %v236_v53 = vld [vmem:[#allocation5 + $0x570] sm:$0xff]  ;;  %v229_v54 = vld [vmem:[#allocation5 + $0x538] sm:$0xff] }
  0xfc   :  { %2161 = vmatpush1.bf16.msra.mxu0 %v2792_v47  ;;  %2234 = vmatpush1.bf16.msra.mxu1 %v2794_v49  ;;  %v213_v47 = vld [vmem:[#allocation5 + $0x4b8] sm:$0xff] }
  0xfd   :  { %2162 = vmatprep.subr.bf16.mxu0 %v2809_v50  ;;  %2235 = vmatprep.subr.bf16.mxu1 %v2811_v51  ;;  %v221_v49 = vld [vmem:[#allocation5 + $0x4f8] sm:$0xff]  ;;  %v2920_v50 = vcombine.low %v196_v36, %v204_v38  ;;  %v2922_v51 = vcombine.low %v197_v39, %v205_v40  ;;  %v3185_v40 = vld [vmem:[#allocation2] ss:$8 sps:$4 sm:$0xff]  }
  0xfe   :  { %2056 = vmatprep.mubr.bf16.mxu0 %v3359_v19  ;;  %2129 = vmatprep.mubr.bf16.mxu1 %v3359_v19  ;;  %v2842_v19 = vcombine.low %v117_v63, %v125_v0  ;;  %v252_v63 = vld [vmem:[#allocation5 + $0x5f0] sm:$0xff]  ;;  %v245_v0 = vld [vmem:[#allocation5 + $0x5b8] sm:$0xff] }
 0x100   :  { %2163 = vmatpush1.bf16.msra.mxu0 %v2808_v57  ;;  %2236 = vmatpush1.bf16.msra.mxu1 %v2810_v58  ;;  %v237_v57 = vld [vmem:[#allocation5 + $0x578] sm:$0xff]  ;;  %v2936_v58 = vcombine.low %v212_v44, %v220_v45  ;;  %v3188_v44 = vld [vmem:[#allocation2 + $0x24] ss:$8 sps:$4 sm:$0xff]  }
 0x101   :  { %2164 = vmatprep.subr.bf16.mxu0 %v2825_v59  ;;  %2237 = vmatprep.subr.bf16.mxu1 %v2827_v60  ;;  %v2938_v59 = vcombine.low %v213_v47, %v221_v49  ;;  %v2953_v60 = vcombine.high %v228_v52, %v236_v53  ;;  %v2955_v61 = vcombine.high %v229_v54, %v237_v57 }
 0x103   :  { %2057 = vmatmul.mubr.bf16.gmra.mrb[36].mxu0 %v3365_v30  ;;  %2130 = vmatmul.mubr.bf16.gmra.mrb[36].mxu1 %v3365_v30  ;;  %v2873_v30 = vcombine.high %v148_v13, %v156_v14  ;;  %v276_v14 = vld [vmem:[#allocation5 + $0x6b0] sm:$0xff] }
 0x104   :  { %2165 = vmatpush1.bf16.msra.mxu0 %v2824_v1  ;;  %2238 = vmatpush1.bf16.msra.mxu1 %v2826_v10  ;;  %v253_v1 = vld [vmem:[#allocation5 + $0x5f8] sm:$0xff]  ;;  %v2952_v10 = vcombine.low %v228_v52, %v236_v53 }
 0x105   :  { %2166 = vmatprep.subr.bf16.mxu0 %v2841_v2  ;;  %2239 = vmatprep.subr.bf16.mxu1 %v2843_v4  ;;  %v2954_v2 = vcombine.low %v229_v54, %v237_v57  ;;  %v2969_v4 = vcombine.high %v244_v62, %v252_v63  ;;  %v2971_v5 = vcombine.high %v245_v0, %v253_v1  ;;  %v3190_v53 = vld [vmem:[#allocation2 + $0x34] ss:$8 sps:$4 sm:$0xff]  }
 0x106   :  { %2066 = vmatprep.mubr.bf16.mxu0 %v3367_v37  ;;  %2139 = vmatprep.mubr.bf16.mxu1 %v3367_v37  ;;  %v2874_v37 = vcombine.low %v149_v15, %v157_v16  ;;  %v284_v15 = vld [vmem:[#allocation5 + $0x6f0] sm:$0xff]  ;;  %v277_v16 = vld [vmem:[#allocation5 + $0x6b8] sm:$0xff] }
 0x108   :  { %2167 = vmatpush1.bf16.msra.mxu0 %v2840_v9  ;;  %2240 = vmatpush1.bf16.msra.mxu1 %v2842_v19  ;;  %v269_v9 = vld [vmem:[#allocation5 + $0x678] sm:$0xff]  ;;  %v2968_v19 = vcombine.low %v244_v62, %v252_v63 }
 0x109   :  { %2168 = vmatprep.subr.bf16.mxu0 %v2857_v11  ;;  %2241 = vmatprep.subr.bf16.mxu1 %v2859_v12  ;;  %v2970_v11 = vcombine.low %v245_v0, %v253_v1  ;;  %v2985_v12 = vcombine.high %v260_v6, %v268_v7  ;;  %v2987_v13 = vcombine.high %v261_v8, %v269_v9 }
 0x10b   :  { %2067 = vmatmul.mubr.bf16.gmra.mrb[40].mxu0 %v3373_v48  ;;  %2140 = vmatmul.mubr.bf16.gmra.mrb[40].mxu1 %v3373_v48  ;;  %v2905_v48 = vcombine.high %v180_v28, %v188_v29  ;;  %v308_v29 = vld [vmem:[#allocation5 + $0x7b0] sm:$0xff] }
 0x10c   :  { %2169 = vmatpush1.bf16.msra.mxu0 %v2856_v17  ;;  %2242 = vmatpush1.bf16.msra.mxu1 %v2858_v18  ;;  %v285_v17 = vld [vmem:[#allocation5 + $0x6f8] sm:$0xff]  ;;  %v2984_v18 = vcombine.low %v260_v6, %v268_v7 }
 0x10d   :  { %2170 = vmatprep.subr.bf16.mxu0 %v2873_v30  ;;  %2243 = vmatprep.subr.bf16.mxu1 %v2875_v20  ;;  %v2986_v30 = vcombine.low %v261_v8, %v269_v9  ;;  %v3001_v20 = vcombine.high %v276_v14, %v284_v15  ;;  %v3003_v21 = vcombine.high %v277_v16, %v285_v17 }
 0x10e   :  { %2076 = vmatprep.mubr.bf16.mxu0 %v3375_v55  ;;  %2149 = vmatprep.mubr.bf16.mxu1 %v3375_v55  ;;  %v2906_v55 = vcombine.low %v181_v31, %v189_v32  ;;  %v316_v31 = vld [vmem:[#allocation5 + $0x7f0] sm:$0xff]  ;;  %v309_v32 = vld [vmem:[#allocation5 + $0x7b8] sm:$0xff] }
 0x10f   :  { %v3032_v38 = vcombine.low %v308_v29, %v316_v31 }
 0x110   :  { %2171 = vmatpush1.bf16.msra.mxu0 %v2872_v25  ;;  %2244 = vmatpush1.bf16.msra.mxu1 %v2874_v37  ;;  %v301_v25 = vld [vmem:[#allocation5 + $0x778] sm:$0xff]  ;;  %v3000_v37 = vcombine.low %v276_v14, %v284_v15 }
 0x111   :  { %2172 = vmatprep.subr.bf16.mxu0 %v2889_v26  ;;  %2245 = vmatprep.subr.bf16.mxu1 %v2891_v27  ;;  %v3002_v26 = vcombine.low %v277_v16, %v285_v17  ;;  %v3017_v27 = vcombine.high %v292_v22, %v300_v23  ;;  %v3019_v28 = vcombine.high %v293_v24, %v301_v25 }
 0x113   :  { %2077 = vmatmul.mubr.bf16.gmra.mrb[44].mxu0 %v3381_v3  ;;  %2150 = vmatmul.mubr.bf16.gmra.mrb[44].mxu1 %v3381_v3  ;;  %v2939_v3 = vcombine.high %v213_v47, %v221_v49 }
 0x114   :  { %2173 = vmatpush1.bf16.msra.mxu0 %v2888_v33  ;;  %2246 = vmatpush1.bf16.msra.mxu1 %v2890_v34  ;;  %v317_v33 = vld [vmem:[#allocation5 + $0x7f8] sm:$0xff]  ;;  %v3016_v34 = vcombine.low %v292_v22, %v300_v23 }
 0x115   :  { %2174 = vmatprep.subr.bf16.mxu0 %v2905_v48  ;;  %2247 = vmatprep.subr.bf16.mxu1 %v2907_v35  ;;  %v3018_v48 = vcombine.low %v293_v24, %v301_v25  ;;  %v3033_v35 = vcombine.high %v308_v29, %v316_v31  ;;  %v3035_v36 = vcombine.high %v309_v32, %v317_v33 }
 0x116   :  { %2192 = vmatprep.mubr.bf16.mxu0 %v3184_v46  ;;  %2265 = vmatprep.mubr.bf16.mxu1 %v3184_v46  ;;  %v3034_v39 = vcombine.low %v309_v32, %v317_v33  ;;  %v3420_v46 = vld [vmem:[#allocation7] sm:$0xff] }
 0x118   :  { %2175 = vmatpush1.bf16.msra.mxu0 %v2904_v41  ;;  %2248 = vmatpush1.bf16.msra.mxu1 %v2906_v55  ;;  %v3186_v41 = vld [vmem:[#allocation2 + $0x14] ss:$8 sps:$4 sm:$0xff]   ;;  %v322_v55 = vlaneseq }
 0x119   :  { %2176 = vmatprep.subr.bf16.mxu0 %v2921_v42  ;;  %2249 = vmatprep.subr.bf16.mxu1 %v2923_v43  ;;  %v3187_v42 = vld [vmem:[#allocation2 + $0x10] ss:$8 sps:$4 sm:$0xff]  }
 0x11a   :  { %v3417_v43 = vshrl.u32 %v322_v55, 7 }
 0x11c   :  { %2177 = vmatpush1.bf16.msra.mxu0 %v2920_v50  ;;  %2250 = vmatpush1.bf16.msra.mxu1 %v2922_v51  ;;  %v324_v45 = vsub.s32 0, %v3417_v43  ;;  %v332_v47 = vsub.s32 2, %v3417_v43  ;;  %v328_v49 = vsub.s32 1, %v3417_v43  ;;  %v336_v50 = vsub.s32 3, %v3417_v43  ;;  %v3189_v51 = vld [vmem:[#allocation2 + $0x20] ss:$8 sps:$4 sm:$0xff]  }
 0x11d   :  { %2178 = vmatprep.subr.bf16.mxu0 %v2937_v56  ;;  %2251 = vmatprep.subr.bf16.mxu1 %v2939_v3 }
 0x11e   :  { %v3428_v56 = vrot.slane %v3420_v46, %v324_v45  ;;  %v3433_v3 = vrot.slane %v3420_v46, %v332_v47  ;;  %v3438_v52 = vrot.slane %v3420_v46, %v328_v49  ;;  %v3443_v54 = vrot.slane %v3420_v46, %v336_v50 }
 0x120   :  { %2179 = vmatpush1.bf16.msra.mxu0 %v2936_v58  ;;  %2252 = vmatpush1.bf16.msra.mxu1 %v2938_v59 }
 0x121   :  { %2180 = vmatprep.subr.bf16.mxu0 %v2953_v60  ;;  %2253 = vmatprep.subr.bf16.mxu1 %v2955_v61 }
 0x124   :  { %2181 = vmatpush1.bf16.msra.mxu0 %v2952_v10  ;;  %2254 = vmatpush1.bf16.msra.mxu1 %v2954_v2 }
 0x125   :  { %2182 = vmatprep.subr.bf16.mxu0 %v2969_v4  ;;  %2255 = vmatprep.subr.bf16.mxu1 %v2971_v5 }
 0x128   :  { %2183 = vmatpush1.bf16.msra.mxu0 %v2968_v19  ;;  %2256 = vmatpush1.bf16.msra.mxu1 %v2970_v11  ;;  %v3191_v11 = vld [vmem:[#allocation2 + $0x30] ss:$8 sps:$4 sm:$0xff]  }
 0x129   :  { %2184 = vmatprep.subr.bf16.mxu0 %v2985_v12  ;;  %2257 = vmatprep.subr.bf16.mxu1 %v2987_v13 }
 0x12c   :  { %2185 = vmatpush1.bf16.msra.mxu0 %v2984_v18  ;;  %2258 = vmatpush1.bf16.msra.mxu1 %v2986_v30 }
 0x12d   :  { %2186 = vmatprep.subr.bf16.mxu0 %v3001_v20  ;;  %2259 = vmatprep.subr.bf16.mxu1 %v3003_v21 }
 0x130   :  { %2187 = vmatpush1.bf16.msra.mxu0 %v3000_v37  ;;  %2260 = vmatpush1.bf16.msra.mxu1 %v3002_v26 }
 0x131   :  { %2188 = vmatprep.subr.bf16.mxu0 %v3017_v27  ;;  %2261 = vmatprep.subr.bf16.mxu1 %v3019_v28 }
 0x134   :  { %2189 = vmatpush1.bf16.msra.mxu0 %v3016_v34  ;;  %2262 = vmatpush1.bf16.msra.mxu1 %v3018_v48 }
 0x135   :  { %2190 = vmatprep.subr.bf16.mxu0 %v3033_v35  ;;  %2263 = vmatprep.subr.bf16.mxu1 %v3035_v36 }
 0x138   :  { %2191 = vmatpush1.bf16.msra.mxu0 %v3032_v38  ;;  %2264 = vmatpush1.bf16.msra.mxu1 %v3034_v39 }
 0x13b   :  { %2193 = vmatmul.mubr.bf16.vlgmr.msra.gmra.mrb[48].mxu0 %v3185_v40  ;;  %2266 = vmatmul.mubr.bf16.vlgmr.msra.gmra.mrb[48].mxu1 %v3185_v40 }
 0x13c   :  { %2202 = vmatprep.mubr.bf16.mxu0 %v3186_v41  ;;  %2275 = vmatprep.mubr.bf16.mxu1 %v3186_v41 }
 0x143   :  { %2203 = vmatmul.mubr.bf16.gmra.mrb[52].mxu0 %v3187_v42  ;;  %2276 = vmatmul.mubr.bf16.gmra.mrb[52].mxu1 %v3187_v42 }
 0x144   :  { %2212 = vmatprep.mubr.bf16.mxu0 %v3188_v44  ;;  %2285 = vmatprep.mubr.bf16.mxu1 %v3188_v44 }
 0x14b   :  { %2213 = vmatmul.mubr.bf16.gmra.mrb[56].mxu0 %v3189_v51  ;;  %2286 = vmatmul.mubr.bf16.gmra.mrb[56].mxu1 %v3189_v51 }
 0x14c   :  { %2222 = vmatprep.mubr.bf16.mxu0 %v3190_v53  ;;  %2295 = vmatprep.mubr.bf16.mxu1 %v3190_v53 }
 0x14e   :  { %v1756_v57 = vpop.f32.mrb[0].mxu0  ;;  %v1829_v59 = vpop.f32.mrb[0].mxu1 }
 0x14f   :  { %v1757_v58 = vadd.f32 %v1756_v57, %v3428_v56  ;;  %v1758_v60 = vpop.f32.mrb[1].mxu0  ;;  %v1830_v61 = vadd.f32 %v1829_v59, %v3433_v3  ;;  %v1831_v63 = vpop.f32.mrb[1].mxu1 }
 0x150   :  { %v1759_v62 = vadd.f32 %v1758_v60, %v3438_v52  ;;  %v1760_v0 = vpop.f32.mrb[2].mxu0  ;;  %v1832_v1 = vadd.f32 %v1831_v63, %v3443_v54  ;;  %v1833_v2 = vpop.f32.mrb[2].mxu1 }
 0x151   :  { %v1761_v10 = vadd.f32 %v1760_v0, %v3428_v56  ;;  %v1762_v4 = vpop.f32.mrb[3].mxu0  ;;  %v1834_v6 = vadd.f32 %v1833_v2, %v3433_v3  ;;  %v1835_v8 = vpop.f32.mrb[3].mxu1 }
 0x152   :  { %v3100_v5 = vpack.c.bf16 %v1759_v62, %v1757_v58  ;;  %v1763_v7 = vadd.f32 %v1762_v4, %v3438_v52  ;;  %v3101_v9 = vpack.c.bf16 %v1832_v1, %v1830_v61  ;;  %v1836_v19 = vadd.f32 %v1835_v8, %v3443_v54 }
 0x153   :  { %2223 = vmatmul.mubr.bf16.gmra.mrb[60].mxu0 %v3191_v11  ;;  %2296 = vmatmul.mubr.bf16.gmra.mrb[60].mxu1 %v3191_v11 }
 0x154   :  { %2690 = vst [vmem:[#allocation8] sm:$0xff] %v3100_v5  ;;  %v3108_v12 = vpack.c.bf16 %v1763_v7, %v1761_v10  ;;  %2691 = vst [vmem:[#allocation8 + $0x8] sm:$0xff] %v3101_v9  ;;  %v3109_v13 = vpack.c.bf16 %v1836_v19, %v1834_v6 }
 0x156   :  { %2698 = vst [vmem:[#allocation8 + $0x40] sm:$0xff] %v3108_v12  ;;  %v1766_v14 = vpop.f32.mrb[4].mxu0  ;;  %2699 = vst [vmem:[#allocation8 + $0x48] sm:$0xff] %v3109_v13  ;;  %v1839_v16 = vpop.f32.mrb[4].mxu1 }
 0x157   :  { %v1767_v15 = vadd.f32 %v1766_v14, %v3428_v56  ;;  %v1768_v17 = vpop.f32.mrb[5].mxu0  ;;  %v1840_v18 = vadd.f32 %v1839_v16, %v3433_v3  ;;  %v1841_v20 = vpop.f32.mrb[5].mxu1 }
 0x158   :  { %v1769_v30 = vadd.f32 %v1768_v17, %v3438_v52  ;;  %v1770_v21 = vpop.f32.mrb[6].mxu0  ;;  %v1842_v22 = vadd.f32 %v1841_v20, %v3443_v54  ;;  %v1843_v24 = vpop.f32.mrb[6].mxu1  ;;  %v340_v20 = vsub.s32 4, %v3417_v43 }
 0x159   :  { %v1771_v23 = vadd.f32 %v1770_v21, %v3428_v56  ;;  %v1772_v25 = vpop.f32.mrb[7].mxu0  ;;  %v1844_v26 = vadd.f32 %v1843_v24, %v3433_v3  ;;  %v1845_v28 = vpop.f32.mrb[7].mxu1  ;;  %v344_v21 = vsub.s32 5, %v3417_v43 }
 0x15a   :  { %v3116_v37 = vpack.c.bf16 %v1769_v30, %v1767_v15  ;;  %v1773_v27 = vadd.f32 %v1772_v25, %v3438_v52  ;;  %v3117_v29 = vpack.c.bf16 %v1842_v22, %v1840_v18  ;;  %v1846_v31 = vadd.f32 %v1845_v28, %v3443_v54 }
 0x15b   :  { %v3494_v22 = vrot.slane %v3420_v46, %v344_v21 }
 0x15c   :  { %2706 = vst [vmem:[#allocation8 + $0x80] sm:$0xff] %v3116_v37  ;;  %v3124_v32 = vpack.c.bf16 %v1773_v27, %v1771_v23  ;;  %2707 = vst [vmem:[#allocation8 + $0x88] sm:$0xff] %v3117_v29  ;;  %v3125_v33 = vpack.c.bf16 %v1846_v31, %v1844_v26 }
 0x15e   :  { %2714 = vst [vmem:[#allocation8 + $0xc0] sm:$0xff] %v3124_v32  ;;  %v1776_v34 = vpop.f32.mrb[8].mxu0  ;;  %2715 = vst [vmem:[#allocation8 + $0xc8] sm:$0xff] %v3125_v33  ;;  %v1849_v35 = vpop.f32.mrb[8].mxu1 }
 0x15f   :  { %v1777_v48 = vadd.f32 %v1776_v34, %v3428_v56  ;;  %v1778_v36 = vpop.f32.mrb[9].mxu0  ;;  %v1850_v38 = vadd.f32 %v1849_v35, %v3433_v3  ;;  %v1851_v40 = vpop.f32.mrb[9].mxu1 }
 0x160   :  { %v1779_v39 = vadd.f32 %v1778_v36, %v3438_v52  ;;  %v1780_v41 = vpop.f32.mrb[10].mxu0  ;;  %v1852_v55 = vadd.f32 %v1851_v40, %v3443_v54  ;;  %v1853_v44 = vpop.f32.mrb[10].mxu1 }
 0x161   :  { %v1781_v42 = vadd.f32 %v1780_v41, %v3428_v56  ;;  %v1782_v51 = vpop.f32.mrb[11].mxu0  ;;  %v1854_v57 = vadd.f32 %v1853_v44, %v3433_v3  ;;  %v1855_v59 = vpop.f32.mrb[11].mxu1 }
 0x162   :  { %v3132_v53 = vpack.c.bf16 %v1779_v39, %v1777_v48  ;;  %v1783_v58 = vadd.f32 %v1782_v51, %v3438_v52  ;;  %v3133_v60 = vpack.c.bf16 %v1852_v55, %v1850_v38  ;;  %v1856_v61 = vadd.f32 %v1855_v59, %v3443_v54 }
 0x164   :  { %2722 = vst [vmem:[#allocation8 + $0x100] sm:$0xff] %v3132_v53  ;;  %v3140_v62 = vpack.c.bf16 %v1783_v58, %v1781_v42  ;;  %2723 = vst [vmem:[#allocation8 + $0x108] sm:$0xff] %v3133_v60  ;;  %v3141_v63 = vpack.c.bf16 %v1856_v61, %v1854_v57 }
 0x166   :  { %2730 = vst [vmem:[#allocation8 + $0x140] sm:$0xff] %v3140_v62  ;;  %v1786_v0 = vpop.f32.mrb[12].mxu0  ;;  %2731 = vst [vmem:[#allocation8 + $0x148] sm:$0xff] %v3141_v63  ;;  %v1859_v10 = vpop.f32.mrb[12].mxu1 }
 0x167   :  { %v1787_v1 = vadd.f32 %v1786_v0, %v3428_v56  ;;  %v1788_v2 = vpop.f32.mrb[13].mxu0  ;;  %v1860_v4 = vadd.f32 %v1859_v10, %v3433_v3  ;;  %v1861_v6 = vpop.f32.mrb[13].mxu1 }
 0x168   :  { %v1789_v5 = vadd.f32 %v1788_v2, %v3438_v52  ;;  %v1790_v7 = vpop.f32.mrb[14].mxu0  ;;  %v1862_v8 = vadd.f32 %v1861_v6, %v3443_v54  ;;  %v1863_v19 = vpop.f32.mrb[14].mxu1 }
 0x169   :  { %v1791_v9 = vadd.f32 %v1790_v7, %v3428_v56  ;;  %v1792_v11 = vpop.f32.mrb[15].mxu0  ;;  %v1864_v13 = vadd.f32 %v1863_v19, %v3433_v3  ;;  %v1865_v15 = vpop.f32.mrb[15].mxu1  ;;  %v348_v56 = vsub.s32 6, %v3417_v43  ;;  %v352_v3 = vsub.s32 7, %v3417_v43 }
 0x16a   :  { %v3148_v12 = vpack.c.bf16 %v1789_v5, %v1787_v1  ;;  %v1793_v14 = vadd.f32 %v1792_v11, %v3438_v52  ;;  %v3149_v16 = vpack.c.bf16 %v1862_v8, %v1860_v4  ;;  %v1866_v17 = vadd.f32 %v1865_v15, %v3443_v54 }
 0x16b   :  { %v3484_v52 = vrot.slane %v3420_v46, %v340_v20  ;;  %v3489_v54 = vrot.slane %v3420_v46, %v348_v56  ;;  %v3499_v23 = vrot.slane %v3420_v46, %v352_v3 }
 0x16c   :  { %2738 = vst [vmem:[#allocation8 + $0x180] sm:$0xff] %v3148_v12  ;;  %v3156_v18 = vpack.c.bf16 %v1793_v14, %v1791_v9  ;;  %2739 = vst [vmem:[#allocation8 + $0x188] sm:$0xff] %v3149_v16  ;;  %v3157_v30 = vpack.c.bf16 %v1866_v17, %v1864_v13 }
 0x16e   :  { %2746 = vst [vmem:[#allocation8 + $0x1c0] sm:$0xff] %v3156_v18  ;;  %2747 = vst [vmem:[#allocation8 + $0x1c8] sm:$0xff] %v3157_v30 }
 0x18e   :  { %v1902_v24 = vpop.f32.mrb[16].mxu0  ;;  %v1975_v37 = vpop.f32.mrb[16].mxu1 }
 0x18f   :  { %v1903_v25 = vadd.f32 %v1902_v24, %v3484_v52  ;;  %v1904_v26 = vpop.f32.mrb[17].mxu0  ;;  %v1976_v27 = vadd.f32 %v1975_v37, %v3489_v54  ;;  %v1977_v29 = vpop.f32.mrb[17].mxu1 }
 0x190   :  { %v1905_v28 = vadd.f32 %v1904_v26, %v3494_v22  ;;  %v1906_v31 = vpop.f32.mrb[18].mxu0  ;;  %v1978_v32 = vadd.f32 %v1977_v29, %v3499_v23  ;;  %v1979_v34 = vpop.f32.mrb[18].mxu1 }
 0x191   :  { %v1907_v33 = vadd.f32 %v1906_v31, %v3484_v52  ;;  %v1908_v48 = vpop.f32.mrb[19].mxu0  ;;  %v1980_v46 = vadd.f32 %v1979_v34, %v3489_v54  ;;  %v1981_v38 = vpop.f32.mrb[19].mxu1 }
 0x192   :  { %v3102_v35 = vpack.c.bf16 %v1905_v28, %v1903_v25  ;;  %v1909_v36 = vadd.f32 %v1908_v48, %v3494_v22  ;;  %v3103_v39 = vpack.c.bf16 %v1978_v32, %v1976_v27  ;;  %v1982_v40 = vadd.f32 %v1981_v38, %v3499_v23 }
 0x194   :  { %2692 = vst [vmem:[#allocation8 + $0x10] sm:$0xff] %v3102_v35  ;;  %v3110_v41 = vpack.c.bf16 %v1909_v36, %v1907_v33  ;;  %2693 = vst [vmem:[#allocation8 + $0x18] sm:$0xff] %v3103_v39  ;;  %v3111_v55 = vpack.c.bf16 %v1982_v40, %v1980_v46 }
 0x196   :  { %2700 = vst [vmem:[#allocation8 + $0x50] sm:$0xff] %v3110_v41  ;;  %v1912_v42 = vpop.f32.mrb[20].mxu0  ;;  %2701 = vst [vmem:[#allocation8 + $0x58] sm:$0xff] %v3111_v55  ;;  %v1985_v51 = vpop.f32.mrb[20].mxu1 }
 0x197   :  { %v1913_v44 = vadd.f32 %v1912_v42, %v3484_v52  ;;  %v1914_v53 = vpop.f32.mrb[21].mxu0  ;;  %v1986_v57 = vadd.f32 %v1985_v51, %v3489_v54  ;;  %v1987_v59 = vpop.f32.mrb[21].mxu1 }
 0x198   :  { %v1915_v58 = vadd.f32 %v1914_v53, %v3494_v22  ;;  %v1916_v60 = vpop.f32.mrb[22].mxu0  ;;  %v1988_v61 = vadd.f32 %v1987_v59, %v3499_v23  ;;  %v1989_v63 = vpop.f32.mrb[22].mxu1 }
 0x199   :  { %v1917_v62 = vadd.f32 %v1916_v60, %v3484_v52  ;;  %v1918_v0 = vpop.f32.mrb[23].mxu0  ;;  %v1990_v10 = vadd.f32 %v1989_v63, %v3489_v54  ;;  %v1991_v4 = vpop.f32.mrb[23].mxu1 }
 0x19a   :  { %v3118_v1 = vpack.c.bf16 %v1915_v58, %v1913_v44  ;;  %v1919_v2 = vadd.f32 %v1918_v0, %v3494_v22  ;;  %v3119_v5 = vpack.c.bf16 %v1988_v61, %v1986_v57  ;;  %v1992_v6 = vadd.f32 %v1991_v4, %v3499_v23 }
 0x19c   :  { %2708 = vst [vmem:[#allocation8 + $0x90] sm:$0xff] %v3118_v1  ;;  %v3126_v7 = vpack.c.bf16 %v1919_v2, %v1917_v62  ;;  %2709 = vst [vmem:[#allocation8 + $0x98] sm:$0xff] %v3119_v5  ;;  %v3127_v8 = vpack.c.bf16 %v1992_v6, %v1990_v10  ;;  %v3533_v62 = vld [vmem:[#allocation7 + $0x8] sm:$0xff] }
 0x19e   :  { %2716 = vst [vmem:[#allocation8 + $0xd0] sm:$0xff] %v3126_v7  ;;  %v1922_v9 = vpop.f32.mrb[24].mxu0  ;;  %2717 = vst [vmem:[#allocation8 + $0xd8] sm:$0xff] %v3127_v8  ;;  %v1995_v11 = vpop.f32.mrb[24].mxu1 }
 0x19f   :  { %v1923_v19 = vadd.f32 %v1922_v9, %v3484_v52  ;;  %v1924_v12 = vpop.f32.mrb[25].mxu0  ;;  %v1996_v13 = vadd.f32 %v1995_v11, %v3489_v54  ;;  %v1997_v15 = vpop.f32.mrb[25].mxu1 }
 0x1a0   :  { %v1925_v14 = vadd.f32 %v1924_v12, %v3494_v22  ;;  %v1926_v16 = vpop.f32.mrb[26].mxu0  ;;  %v1998_v17 = vadd.f32 %v1997_v15, %v3499_v23  ;;  %v1999_v30 = vpop.f32.mrb[26].mxu1 }
 0x1a1   :  { %v1927_v18 = vadd.f32 %v1926_v16, %v3484_v52  ;;  %v1928_v24 = vpop.f32.mrb[27].mxu0  ;;  %v2000_v37 = vadd.f32 %v1999_v30, %v3489_v54  ;;  %v2001_v27 = vpop.f32.mrb[27].mxu1 }
 0x1a2   :  { %v3134_v25 = vpack.c.bf16 %v1925_v14, %v1923_v19  ;;  %v1929_v26 = vadd.f32 %v1928_v24, %v3494_v22  ;;  %v3135_v28 = vpack.c.bf16 %v1998_v17, %v1996_v13  ;;  %v2002_v29 = vadd.f32 %v2001_v27, %v3499_v23 }
 0x1a4   :  { %2724 = vst [vmem:[#allocation8 + $0x110] sm:$0xff] %v3134_v25  ;;  %v3142_v31 = vpack.c.bf16 %v1929_v26, %v1927_v18  ;;  %2725 = vst [vmem:[#allocation8 + $0x118] sm:$0xff] %v3135_v28  ;;  %v3143_v32 = vpack.c.bf16 %v2002_v29, %v2000_v37 }
 0x1a6   :  { %2732 = vst [vmem:[#allocation8 + $0x150] sm:$0xff] %v3142_v31  ;;  %v1932_v33 = vpop.f32.mrb[28].mxu0  ;;  %2733 = vst [vmem:[#allocation8 + $0x158] sm:$0xff] %v3143_v32  ;;  %v2005_v48 = vpop.f32.mrb[28].mxu1 }
 0x1a7   :  { %v1933_v34 = vadd.f32 %v1932_v33, %v3484_v52  ;;  %v1934_v35 = vpop.f32.mrb[29].mxu0  ;;  %v2006_v46 = vadd.f32 %v2005_v48, %v3489_v54  ;;  %v2007_v38 = vpop.f32.mrb[29].mxu1 }
 0x1a8   :  { %v1935_v36 = vadd.f32 %v1934_v35, %v3494_v22  ;;  %v1936_v39 = vpop.f32.mrb[30].mxu0  ;;  %v2008_v40 = vadd.f32 %v2007_v38, %v3499_v23  ;;  %v2009_v55 = vpop.f32.mrb[30].mxu1 }
 0x1a9   :  { %v1937_v41 = vadd.f32 %v1936_v39, %v3484_v52  ;;  %v1938_v42 = vpop.f32.mrb[31].mxu0  ;;  %v2010_v51 = vadd.f32 %v2009_v55, %v3489_v54  ;;  %v2011_v57 = vpop.f32.mrb[31].mxu1  ;;  %v3538_v52 = vrot.slane %v3533_v62, %v324_v45  ;;  %v3543_v54 = vrot.slane %v3533_v62, %v332_v47 }
 0x1aa   :  { %v3150_v44 = vpack.c.bf16 %v1935_v36, %v1933_v34  ;;  %v1939_v53 = vadd.f32 %v1938_v42, %v3494_v22  ;;  %v3151_v58 = vpack.c.bf16 %v2008_v40, %v2006_v46  ;;  %v2012_v59 = vadd.f32 %v2011_v57, %v3499_v23 }
 0x1ab   :  { %v3548_v22 = vrot.slane %v3533_v62, %v328_v49  ;;  %v3553_v23 = vrot.slane %v3533_v62, %v336_v50 }
 0x1ac   :  { %2740 = vst [vmem:[#allocation8 + $0x190] sm:$0xff] %v3150_v44  ;;  %v3158_v60 = vpack.c.bf16 %v1939_v53, %v1937_v41  ;;  %2741 = vst [vmem:[#allocation8 + $0x198] sm:$0xff] %v3151_v58  ;;  %v3159_v61 = vpack.c.bf16 %v2012_v59, %v2010_v51 }
 0x1ae   :  { %2748 = vst [vmem:[#allocation8 + $0x1d0] sm:$0xff] %v3158_v60  ;;  %2749 = vst [vmem:[#allocation8 + $0x1d8] sm:$0xff] %v3159_v61 }
 0x1ce   :  { %v2048_v63 = vpop.f32.mrb[32].mxu0  ;;  %v2121_v45 = vpop.f32.mrb[32].mxu1 }
 0x1cf   :  { %v2049_v0 = vadd.f32 %v2048_v63, %v3538_v52  ;;  %v2050_v1 = vpop.f32.mrb[33].mxu0  ;;  %v2122_v10 = vadd.f32 %v2121_v45, %v3543_v54  ;;  %v2123_v2 = vpop.f32.mrb[33].mxu1 }
 0x1d0   :  { %v2051_v47 = vadd.f32 %v2050_v1, %v3548_v22  ;;  %v2052_v4 = vpop.f32.mrb[34].mxu0  ;;  %v2124_v5 = vadd.f32 %v2123_v2, %v3553_v23  ;;  %v2125_v6 = vpop.f32.mrb[34].mxu1 }
 0x1d1   :  { %v2053_v49 = vadd.f32 %v2052_v4, %v3538_v52  ;;  %v2054_v7 = vpop.f32.mrb[35].mxu0  ;;  %v2126_v50 = vadd.f32 %v2125_v6, %v3543_v54  ;;  %v2127_v19 = vpop.f32.mrb[35].mxu1 }
 0x1d2   :  { %v3104_v8 = vpack.c.bf16 %v2051_v47, %v2049_v0  ;;  %v2055_v9 = vadd.f32 %v2054_v7, %v3548_v22  ;;  %v3105_v11 = vpack.c.bf16 %v2124_v5, %v2122_v10  ;;  %v2128_v12 = vadd.f32 %v2127_v19, %v3553_v23 }
 0x1d4   :  { %2694 = vst [vmem:[#allocation8 + $0x20] sm:$0xff] %v3104_v8  ;;  %v3112_v13 = vpack.c.bf16 %v2055_v9, %v2053_v49  ;;  %2695 = vst [vmem:[#allocation8 + $0x28] sm:$0xff] %v3105_v11  ;;  %v3113_v14 = vpack.c.bf16 %v2128_v12, %v2126_v50 }
 0x1d6   :  { %2702 = vst [vmem:[#allocation8 + $0x60] sm:$0xff] %v3112_v13  ;;  %v2058_v15 = vpop.f32.mrb[36].mxu0  ;;  %2703 = vst [vmem:[#allocation8 + $0x68] sm:$0xff] %v3113_v14  ;;  %v2131_v17 = vpop.f32.mrb[36].mxu1 }
 0x1d7   :  { %v2059_v16 = vadd.f32 %v2058_v15, %v3538_v52  ;;  %v2060_v18 = vpop.f32.mrb[37].mxu0  ;;  %v2132_v30 = vadd.f32 %v2131_v17, %v3543_v54  ;;  %v2133_v25 = vpop.f32.mrb[37].mxu1 }
 0x1d8   :  { %v2061_v24 = vadd.f32 %v2060_v18, %v3548_v22  ;;  %v2062_v37 = vpop.f32.mrb[38].mxu0  ;;  %v2134_v26 = vadd.f32 %v2133_v25, %v3553_v23  ;;  %v2135_v28 = vpop.f32.mrb[38].mxu1 }
 0x1d9   :  { %v2063_v27 = vadd.f32 %v2062_v37, %v3538_v52  ;;  %v2064_v29 = vpop.f32.mrb[39].mxu0  ;;  %v2136_v32 = vadd.f32 %v2135_v28, %v3543_v54  ;;  %v2137_v34 = vpop.f32.mrb[39].mxu1 }
 0x1da   :  { %v3120_v31 = vpack.c.bf16 %v2061_v24, %v2059_v16  ;;  %v2065_v33 = vadd.f32 %v2064_v29, %v3548_v22  ;;  %v3121_v48 = vpack.c.bf16 %v2134_v26, %v2132_v30  ;;  %v2138_v35 = vadd.f32 %v2137_v34, %v3553_v23 }
 0x1dc   :  { %2710 = vst [vmem:[#allocation8 + $0xa0] sm:$0xff] %v3120_v31  ;;  %v3128_v46 = vpack.c.bf16 %v2065_v33, %v2063_v27  ;;  %2711 = vst [vmem:[#allocation8 + $0xa8] sm:$0xff] %v3121_v48  ;;  %v3129_v36 = vpack.c.bf16 %v2138_v35, %v2136_v32 }
 0x1de   :  { %2718 = vst [vmem:[#allocation8 + $0xe0] sm:$0xff] %v3128_v46  ;;  %v2068_v38 = vpop.f32.mrb[40].mxu0  ;;  %2719 = vst [vmem:[#allocation8 + $0xe8] sm:$0xff] %v3129_v36  ;;  %v2141_v40 = vpop.f32.mrb[40].mxu1 }
 0x1df   :  { %v2069_v39 = vadd.f32 %v2068_v38, %v3538_v52  ;;  %v2070_v41 = vpop.f32.mrb[41].mxu0  ;;  %v2142_v55 = vadd.f32 %v2141_v40, %v3543_v54  ;;  %v2143_v44 = vpop.f32.mrb[41].mxu1 }
 0x1e0   :  { %v2071_v42 = vadd.f32 %v2070_v41, %v3548_v22  ;;  %v2072_v51 = vpop.f32.mrb[42].mxu0  ;;  %v2144_v53 = vadd.f32 %v2143_v44, %v3553_v23  ;;  %v2145_v58 = vpop.f32.mrb[42].mxu1 }
 0x1e1   :  { %v2073_v57 = vadd.f32 %v2072_v51, %v3538_v52  ;;  %v2074_v59 = vpop.f32.mrb[43].mxu0  ;;  %v2146_v61 = vadd.f32 %v2145_v58, %v3543_v54  ;;  %v2147_v0 = vpop.f32.mrb[43].mxu1 }
 0x1e2   :  { %v3136_v60 = vpack.c.bf16 %v2071_v42, %v2069_v39  ;;  %v2075_v63 = vadd.f32 %v2074_v59, %v3548_v22  ;;  %v3137_v45 = vpack.c.bf16 %v2144_v53, %v2142_v55  ;;  %v2148_v1 = vadd.f32 %v2147_v0, %v3553_v23 }
 0x1e4   :  { %2726 = vst [vmem:[#allocation8 + $0x120] sm:$0xff] %v3136_v60  ;;  %v3144_v10 = vpack.c.bf16 %v2075_v63, %v2073_v57  ;;  %2727 = vst [vmem:[#allocation8 + $0x128] sm:$0xff] %v3137_v45  ;;  %v3145_v47 = vpack.c.bf16 %v2148_v1, %v2146_v61 }
 0x1e6   :  { %2734 = vst [vmem:[#allocation8 + $0x160] sm:$0xff] %v3144_v10  ;;  %v2078_v2 = vpop.f32.mrb[44].mxu0  ;;  %2735 = vst [vmem:[#allocation8 + $0x168] sm:$0xff] %v3145_v47  ;;  %v2151_v5 = vpop.f32.mrb[44].mxu1 }
 0x1e7   :  { %v2079_v4 = vadd.f32 %v2078_v2, %v3538_v52  ;;  %v2080_v49 = vpop.f32.mrb[45].mxu0  ;;  %v2152_v6 = vadd.f32 %v2151_v5, %v3543_v54  ;;  %v2153_v8 = vpop.f32.mrb[45].mxu1 }
 0x1e8   :  { %v2081_v7 = vadd.f32 %v2080_v49, %v3548_v22  ;;  %v2082_v50 = vpop.f32.mrb[46].mxu0  ;;  %v2154_v9 = vadd.f32 %v2153_v8, %v3553_v23  ;;  %v2155_v11 = vpop.f32.mrb[46].mxu1 }
 0x1e9   :  { %v2083_v19 = vadd.f32 %v2082_v50, %v3538_v52  ;;  %v2084_v12 = vpop.f32.mrb[47].mxu0  ;;  %v2156_v14 = vadd.f32 %v2155_v11, %v3543_v54  ;;  %v2157_v16 = vpop.f32.mrb[47].mxu1  ;;  %v3590_v52 = vrot.slane %v3533_v62, %v340_v20  ;;  %v3595_v54 = vrot.slane %v3533_v62, %v348_v56 }
 0x1ea   :  { %v3152_v13 = vpack.c.bf16 %v2081_v7, %v2079_v4  ;;  %v2085_v15 = vadd.f32 %v2084_v12, %v3548_v22  ;;  %v3153_v17 = vpack.c.bf16 %v2154_v9, %v2152_v6  ;;  %v2158_v18 = vadd.f32 %v2157_v16, %v3553_v23 }
 0x1eb   :  { %v3600_v22 = vrot.slane %v3533_v62, %v344_v21  ;;  %v3605_v23 = vrot.slane %v3533_v62, %v352_v3 }
 0x1ec   :  { %2742 = vst [vmem:[#allocation8 + $0x1a0] sm:$0xff] %v3152_v13  ;;  %v3160_v30 = vpack.c.bf16 %v2085_v15, %v2083_v19  ;;  %2743 = vst [vmem:[#allocation8 + $0x1a8] sm:$0xff] %v3153_v17  ;;  %v3161_v24 = vpack.c.bf16 %v2158_v18, %v2156_v14 }
 0x1ee   :  { %2750 = vst [vmem:[#allocation8 + $0x1e0] sm:$0xff] %v3160_v30  ;;  %2751 = vst [vmem:[#allocation8 + $0x1e8] sm:$0xff] %v3161_v24 }
 0x20e   :  { %v2194_v25 = vpop.f32.mrb[48].mxu0  ;;  %v2267_v20 = vpop.f32.mrb[48].mxu1 }
 0x20f   :  { %v2195_v37 = vadd.f32 %v2194_v25, %v3590_v52  ;;  %v2196_v26 = vpop.f32.mrb[49].mxu0  ;;  %v2268_v27 = vadd.f32 %v2267_v20, %v3595_v54  ;;  %v2269_v28 = vpop.f32.mrb[49].mxu1 }
 0x210   :  { %v2197_v56 = vadd.f32 %v2196_v26, %v3600_v22  ;;  %v2198_v29 = vpop.f32.mrb[50].mxu0  ;;  %v2270_v31 = vadd.f32 %v2269_v28, %v3605_v23  ;;  %v2271_v32 = vpop.f32.mrb[50].mxu1 }
 0x211   :  { %v2199_v21 = vadd.f32 %v2198_v29, %v3590_v52  ;;  %v2200_v43 = vpop.f32.mrb[51].mxu0  ;;  %v2272_v3 = vadd.f32 %v2271_v32, %v3595_v54  ;;  %v2273_v34 = vpop.f32.mrb[51].mxu1 }
 0x212   :  { %v3106_v33 = vpack.c.bf16 %v2197_v56, %v2195_v37  ;;  %v2201_v62 = vadd.f32 %v2200_v43, %v3600_v22  ;;  %v3107_v48 = vpack.c.bf16 %v2270_v31, %v2268_v27  ;;  %v2274_v35 = vadd.f32 %v2273_v34, %v3605_v23 }
 0x214   :  { %2696 = vst [vmem:[#allocation8 + $0x30] sm:$0xff] %v3106_v33  ;;  %v3114_v46 = vpack.c.bf16 %v2201_v62, %v2199_v21  ;;  %2697 = vst [vmem:[#allocation8 + $0x38] sm:$0xff] %v3107_v48  ;;  %v3115_v36 = vpack.c.bf16 %v2274_v35, %v2272_v3 }
 0x216   :  { %2704 = vst [vmem:[#allocation8 + $0x70] sm:$0xff] %v3114_v46  ;;  %v2204_v38 = vpop.f32.mrb[52].mxu0  ;;  %2705 = vst [vmem:[#allocation8 + $0x78] sm:$0xff] %v3115_v36  ;;  %v2277_v40 = vpop.f32.mrb[52].mxu1 }
 0x217   :  { %v2205_v39 = vadd.f32 %v2204_v38, %v3590_v52  ;;  %v2206_v41 = vpop.f32.mrb[53].mxu0  ;;  %v2278_v55 = vadd.f32 %v2277_v40, %v3595_v54  ;;  %v2279_v44 = vpop.f32.mrb[53].mxu1 }
 0x218   :  { %v2207_v42 = vadd.f32 %v2206_v41, %v3600_v22  ;;  %v2208_v51 = vpop.f32.mrb[54].mxu0  ;;  %v2280_v53 = vadd.f32 %v2279_v44, %v3605_v23  ;;  %v2281_v58 = vpop.f32.mrb[54].mxu1 }
 0x219   :  { %v2209_v57 = vadd.f32 %v2208_v51, %v3590_v52  ;;  %v2210_v59 = vpop.f32.mrb[55].mxu0  ;;  %v2282_v61 = vadd.f32 %v2281_v58, %v3595_v54  ;;  %v2283_v0 = vpop.f32.mrb[55].mxu1 }
 0x21a   :  { %v3122_v60 = vpack.c.bf16 %v2207_v42, %v2205_v39  ;;  %v2211_v63 = vadd.f32 %v2210_v59, %v3600_v22  ;;  %v3123_v45 = vpack.c.bf16 %v2280_v53, %v2278_v55  ;;  %v2284_v1 = vadd.f32 %v2283_v0, %v3605_v23 }
 0x21c   :  { %2712 = vst [vmem:[#allocation8 + $0xb0] sm:$0xff] %v3122_v60  ;;  %v3130_v10 = vpack.c.bf16 %v2211_v63, %v2209_v57  ;;  %2713 = vst [vmem:[#allocation8 + $0xb8] sm:$0xff] %v3123_v45  ;;  %v3131_v47 = vpack.c.bf16 %v2284_v1, %v2282_v61 }
 0x21e   :  { %2720 = vst [vmem:[#allocation8 + $0xf0] sm:$0xff] %v3130_v10  ;;  %v2214_v2 = vpop.f32.mrb[56].mxu0  ;;  %2721 = vst [vmem:[#allocation8 + $0xf8] sm:$0xff] %v3131_v47  ;;  %v2287_v5 = vpop.f32.mrb[56].mxu1 }
 0x21f   :  { %v2215_v4 = vadd.f32 %v2214_v2, %v3590_v52  ;;  %v2216_v49 = vpop.f32.mrb[57].mxu0  ;;  %v2288_v6 = vadd.f32 %v2287_v5, %v3595_v54  ;;  %v2289_v8 = vpop.f32.mrb[57].mxu1 }
 0x220   :  { %v2217_v7 = vadd.f32 %v2216_v49, %v3600_v22  ;;  %v2218_v50 = vpop.f32.mrb[58].mxu0  ;;  %v2290_v9 = vadd.f32 %v2289_v8, %v3605_v23  ;;  %v2291_v11 = vpop.f32.mrb[58].mxu1 }
 0x221   :  { %v2219_v19 = vadd.f32 %v2218_v50, %v3590_v52  ;;  %v2220_v12 = vpop.f32.mrb[59].mxu0  ;;  %v2292_v14 = vadd.f32 %v2291_v11, %v3595_v54  ;;  %v2293_v16 = vpop.f32.mrb[59].mxu1 }
 0x222   :  { %v3138_v13 = vpack.c.bf16 %v2217_v7, %v2215_v4  ;;  %v2221_v15 = vadd.f32 %v2220_v12, %v3600_v22  ;;  %v3139_v17 = vpack.c.bf16 %v2290_v9, %v2288_v6  ;;  %v2294_v18 = vadd.f32 %v2293_v16, %v3605_v23 }
 0x224   :  { %2728 = vst [vmem:[#allocation8 + $0x130] sm:$0xff] %v3138_v13  ;;  %v3146_v30 = vpack.c.bf16 %v2221_v15, %v2219_v19  ;;  %2729 = vst [vmem:[#allocation8 + $0x138] sm:$0xff] %v3139_v17  ;;  %v3147_v24 = vpack.c.bf16 %v2294_v18, %v2292_v14 }
 0x226   :  { %2736 = vst [vmem:[#allocation8 + $0x170] sm:$0xff] %v3146_v30  ;;  %v2224_v25 = vpop.f32.mrb[60].mxu0  ;;  %2737 = vst [vmem:[#allocation8 + $0x178] sm:$0xff] %v3147_v24  ;;  %v2297_v20 = vpop.f32.mrb[60].mxu1 }
 0x227   :  { %v2225_v37 = vadd.f32 %v2224_v25, %v3590_v52  ;;  %v2226_v26 = vpop.f32.mrb[61].mxu0  ;;  %v2298_v27 = vadd.f32 %v2297_v20, %v3595_v54  ;;  %v2299_v28 = vpop.f32.mrb[61].mxu1 }
 0x228   :  { %v2227_v56 = vadd.f32 %v2226_v26, %v3600_v22  ;;  %v2228_v29 = vpop.f32.mrb[62].mxu0  ;;  %v2300_v31 = vadd.f32 %v2299_v28, %v3605_v23  ;;  %v2301_v32 = vpop.f32.mrb[62].mxu1 }
 0x229   :  { %v2229_v21 = vadd.f32 %v2228_v29, %v3590_v52  ;;  %v2230_v43 = vpop.f32.mrb[63].mxu0  ;;  %v2302_v3 = vadd.f32 %v2301_v32, %v3595_v54  ;;  %v2303_v34 = vpop.f32.mrb[63].mxu1 }
 0x22a   :  { %v3154_v33 = vpack.c.bf16 %v2227_v56, %v2225_v37  ;;  %v2231_v62 = vadd.f32 %v2230_v43, %v3600_v22  ;;  %v3155_v48 = vpack.c.bf16 %v2300_v31, %v2298_v27  ;;  %v2304_v35 = vadd.f32 %v2303_v34, %v3605_v23 }
 0x22c   :  { %2744 = vst [vmem:[#allocation8 + $0x1b0] sm:$0xff] %v3154_v33  ;;  %v3162_v46 = vpack.c.bf16 %v2231_v62, %v2229_v21  ;;  %2745 = vst [vmem:[#allocation8 + $0x1b8] sm:$0xff] %v3155_v48  ;;  %v3163_v36 = vpack.c.bf16 %v2304_v35, %v2302_v3 }
 0x22e   :  { %2752 = vst [vmem:[#allocation8 + $0x1f0] sm:$0xff] %v3162_v46  ;;  %2753 = vst [vmem:[#allocation8 + $0x1f8] sm:$0xff] %v3163_v36 }
 0x22f   :  { %3269 = shalt.err (!%p3266_p0)
}
 0x230   :  { %s3270_s29 = scalar_lea.hbm %s3657_s3, 8192 }
 0x231   :  { %p3271_p1 = scmp.ne.s32.totalorder %s3657_s3, %s3270_s29  ;;  %p3274_p2 = scmp.lt.u32.totalorder %s3270_s29, %s3657_s3 }
 0x233   :  { %p3276_p3 = pnand %p3274_p2, %p3271_p1 }
 0x235   :  { %3279 = shalt.err (!%p3276_p3)
}
 0x236   :  { %2765 = dma.vmem_to_hbm [thread:$0]  %s2760_s25, 8192, %s3657_s3, [#allocation4], %s3287_s22, %s3287_s22, %s3288_s23  }
 0x237   :  { %3284 = dma.done.wait [#allocation4], 8192  }
 0x238   :  { %3285 = vsyncadd [#allocation4], 4294959104 }
 0x239   :  { %2769 = vsyncpa [#allocation3], 1 }
 0x23a   :  { %2770 = vsyncpa [#allocation6], 1 }
 0x23b   :  { %2771 = vsyncpa [#allocation4], 1 }

</bundles_post_ra>
